<compile_context>
chip_gen: v7x
topology: tpu7x:2x2x1
jax: 0.10.0
libtpu: 0.0.40
codegen_flags: <defaults>
</compile_context>

<pallas_src>
import functools

import jax
import jax.numpy as jnp
from jax.experimental import pallas as pl
from jax.experimental.pallas import tpu as pltpu

LANE = 128          # TPU lane width: output-channel dims are padded to this
ROW_ALIGN = 16      # sublane-alignment floor for row tiles (bf16-safe)
MAX_TK = 2048       # max K columns per grid step (only hit on big real nets)


def _cdiv(a, b):
    return -(-a // b)


def _round_up(x, m):
    return _cdiv(x, m) * m


def _pad_axis(x, axis, new_size):
    pad = new_size - x.shape[axis]
    if pad == 0:
        return x
    widths = [(0, 0)] * x.ndim
    widths[axis] = (0, pad)
    return jnp.pad(x, widths)


@functools.lru_cache(maxsize=1)
def _vmem_limit_bytes():
    cap = 64 * 1024 * 1024
    try:
        cap = int(pltpu.get_tpu_info().vmem_capacity_bytes)
    except Exception:
        pass
    # ~3/4 of physical VMEM: ~48 MiB on v7x (64 MiB), 96 MiB on v5e/v6e (128 MiB)
    return min(cap * 3 // 4, 96 * 1024 * 1024)


def _max_tm():
    return 1024 if _vmem_limit_bytes() >= 80 * 1024 * 1024 else 512


def _choose_tm(M):
    """Row-tile: prefer (a) no M padding and (b) >=2 tiles (v7x megacore)."""
    cap = _max_tm()
    tm = cap
    while tm >= ROW_ALIGN:
        if M % tm == 0 and M // tm >= 2:
            return tm                              # no padding, >=2 row tiles
        tm //= 2
    if M % 8 == 0 and M <= cap:
        return M                                   # single full-extent tile
    return min(cap, _round_up(M, ROW_ALIGN))       # rare: pad + trailing crop


# ----------------------------- Pallas kernels ------------------------------

def _apply_act(x, act):
    if act == "relu":
        return jnp.maximum(x, jnp.float32(0.0))
    if act == "leaky_relu":
        return jnp.maximum(x, jnp.float32(0.2) * x)   # LeakyReLU(0.2)
    return x


def _tap_epilogue(main, t_ref, wt_ref, bt_ref, n_taps, n):
    """main + (max_i tap_i @ W_skip) + b_skip via ONE block-diagonal dot."""
    ext = jnp.dot(t_ref[...], wt_ref[...], preferred_element_type=jnp.float32)
    extra = ext[:, :n]
    for i in range(1, n_taps):
        extra = jnp.maximum(extra, ext[:, i * n:(i + 1) * n])
    return main + extra + bt_ref[...]


def _mm1_kernel(x_ref, w_ref, b_ref, o_ref, *, act):
    acc = jnp.dot(x_ref[...], w_ref[...], preferred_element_type=jnp.float32)
    o_ref[...] = _apply_act(acc + b_ref[...], act).astype(o_ref.dtype)


def _mm1_extra_kernel(x_ref, w_ref, b_ref, t_ref, wt_ref, bt_ref, o_ref, *,
                      act, n_taps):
    acc = jnp.dot(x_ref[...], w_ref[...], preferred_element_type=jnp.float32)
    main = _apply_act(acc + b_ref[...], act)
    o_ref[...] = _tap_epilogue(main, t_ref, wt_ref, bt_ref, n_taps,
                               o_ref.shape[-1]).astype(o_ref.dtype)


def _mmk_kernel(x_ref, w_ref, b_ref, o_ref, acc_ref, *, act):
    k = pl.program_id(1)
    prod = jnp.dot(x_ref[...], w_ref[...], preferred_element_type=jnp.float32)

    @pl.when(k == 0)
    def _():
        acc_ref[...] = prod                 # init with first dot, no zero-fill

    @pl.when(k > 0)
    def _():
        acc_ref[...] = acc_ref[...] + prod

    @pl.when(k == pl.num_programs(1) - 1)
    def _():
        o_ref[...] = _apply_act(acc_ref[...] + b_ref[...], act).astype(o_ref.dtype)


def _mmk_extra_kernel(x_ref, w_ref, b_ref, t_ref, wt_ref, bt_ref, o_ref,
                      acc_ref, *, act, n_taps):
    k = pl.program_id(1)
    prod = jnp.dot(x_ref[...], w_ref[...], preferred_element_type=jnp.float32)

    @pl.when(k == 0)
    def _():
        acc_ref[...] = prod

    @pl.when(k > 0)
    def _():
        acc_ref[...] = acc_ref[...] + prod

    @pl.when(k == pl.num_programs(1) - 1)
    def _():
        main = _apply_act(acc_ref[...] + b_ref[...], act)
        o_ref[...] = _tap_epilogue(main, t_ref, wt_ref, bt_ref, n_taps,
                                   o_ref.shape[-1]).astype(o_ref.dtype)


def _fused_matmul(patches, w_mat, bias, *, act, out_dtype,
                  taps=None, w_taps=None, b_taps=None, n_taps=0):
    """Tiled, auto-pipelined (im2col patches @ weight) with fused f32 epilogue.

    patches: [M, K]  bf16, K a multiple of 128 (padded at im2col time)
    w_mat:   [K, N]  bf16, N a multiple of 128 -> lane-dense stores
    bias:    [N]     f32
    taps:    [M, Kt] bf16, Kt = 128-padded n_taps*Cin_real (optional)
    w_taps:  [Kt, n_taps*N] bf16 block-diagonal 1x1-conv weight
    b_taps:  [N]     f32
    epilogue: act(patches@w + bias) [+ max_i(tap_i@w_skip) + b_skip]
    """
    M, K = patches.shape
    N = w_mat.shape[1]

    tm = _choose_tm(M)
    m_pad = _round_up(M, tm)
    if m_pad != M:
        patches = _pad_axis(patches, 0, m_pad)
        if taps is not None:
            taps = _pad_axis(taps, 0, m_pad)
    num_m = m_pad // tm

    nk = _cdiv(K, MAX_TK)
    tk = _round_up(_cdiv(K, nk), LANE)
    nk = _cdiv(K, tk)
    if tk * nk != K:
        patches = _pad_axis(patches, 1, tk * nk)
        w_mat = _pad_axis(w_mat, 0, tk * nk)

    bias = bias.reshape(1, N).astype(jnp.float32)
    out_shape = jax.ShapeDtypeStruct((m_pad, N), out_dtype)
    cparams = pltpu.CompilerParams(
        dimension_semantics=("parallel",) if nk == 1 else ("parallel", "arbitrary"),
        vmem_limit_bytes=_vmem_limit_bytes())

    extra_args = []
    if n_taps:
        kt = taps.shape[1]
        b_taps = b_taps.reshape(1, N).astype(jnp.float32)
        extra_args = [taps, w_taps, b_taps]

    if nk == 1:
        in_specs = [pl.BlockSpec((tm, tk), lambda i: (i, 0)),
                    pl.BlockSpec((tk, N), lambda i: (0, 0)),
                    pl.BlockSpec((1, N), lambda i: (0, 0))]
        if n_taps:
            in_specs += [pl.BlockSpec((tm, kt), lambda i: (i, 0)),
                         pl.BlockSpec((kt, n_taps * N), lambda i: (0, 0)),
                         pl.BlockSpec((1, N), lambda i: (0, 0))]
            kern = functools.partial(_mm1_extra_kernel, act=act, n_taps=n_taps)
        else:
            kern = functools.partial(_mm1_kernel, act=act)
        out = pl.pallas_call(
            kern, out_shape=out_shape, grid=(num_m,),
            in_specs=in_specs,
            out_specs=pl.BlockSpec((tm, N), lambda i: (i, 0)),
            compiler_params=cparams,
        )(patches, w_mat, bias, *extra_args)
    else:
        in_specs = [pl.BlockSpec((tm, tk), lambda i, k: (i, k)),
                    pl.BlockSpec((tk, N), lambda i, k: (k, 0)),
                    pl.BlockSpec((1, N), lambda i, k: (0, 0))]
        if n_taps:
            in_specs += [pl.BlockSpec((tm, kt), lambda i, k: (i, 0)),
                         pl.BlockSpec((kt, n_taps * N), lambda i, k: (0, 0)),
                         pl.BlockSpec((1, N), lambda i, k: (0, 0))]
            kern = functools.partial(_mmk_extra_kernel, act=act, n_taps=n_taps)
        else:
            kern = functools.partial(_mmk_kernel, act=act)
        out = pl.pallas_call(
            kern, out_shape=out_shape, grid=(num_m, nk),
            in_specs=in_specs,
            out_specs=pl.BlockSpec((tm, N), lambda i, k: (i, 0)),
            scratch_shapes=[pltpu.VMEM((tm, N), jnp.float32)],
            compiler_params=cparams,
        )(patches, w_mat, bias, *extra_args)
    return out if m_pad == M else out[:M]


# ------------------------------- Conv glue ---------------------------------

# TODO(synk): patch formation (reflect pad + shifted-slice concat) is still XLA
# glue that materializes a kh*kw-expanded patches array in HBM; moving it
# in-kernel (halo'd row-tile DMA + shifted VMEM slices) would cut conv input
# HBM reads by ~kh*kw.
def _im2col(x, c_real, kh, kw, stride, pad, pad_mode):
    """x: [B,H,W,C>=c_real] -> ([B*OH*OW, round_up(kh*kw*c_real,128)], (B,OH,OW)).

    Only the real channels are gathered; the total K is padded to a lane
    multiple with a single zero chunk (matching the zero rows appended to the
    packed conv weight in _prep_conv)."""
    B, H, W, _ = x.shape
    xs = x[..., :c_real]
    if pad > 0:
        xs = jnp.pad(xs, ((0, 0), (pad, pad), (pad, pad), (0, 0)), mode=pad_mode)
    Hp, Wp = H + 2 * pad, W + 2 * pad
    OH = (Hp - kh) // stride + 1
    OW = (Wp - kw) // stride + 1
    cols = []
    for i in range(kh):
        for j in range(kw):
            cols.append(xs[:, i:i + (OH - 1) * stride + 1:stride,
                           j:j + (OW - 1) * stride + 1:stride, :])
    k_real = kh * kw * c_real
    k_pad = _round_up(k_real, LANE)
    if k_pad > k_real:
        cols.append(jnp.zeros((B, OH, OW, k_pad - k_real), xs.dtype))
    patches = jnp.concatenate(cols, axis=-1)          # [B, OH, OW, k_pad]
    return patches.reshape(B * OH * OW, k_pad), (B, OH, OW)


# --------------------------- Parameter handling -----------------------------

def spectral_normalize(w, key, n_iter=5):
    # TODO(synk): PyTorch spectral_norm keeps a persistent `u` updated with one
    # power iteration per forward; here we approximate with 5 iterations at init.
    c_out = w.shape[0]
    w_mat = w.reshape(c_out, -1)
    u = jax.random.normal(key, (c_out,), dtype=jnp.float32)
    u = u / (jnp.linalg.norm(u) + 1e-12)
    v = None
    for _ in range(n_iter):
        v = w_mat.T @ u
        v = v / (jnp.linalg.norm(v) + 1e-12)
        u = w_mat @ v
        u = u / (jnp.linalg.norm(u) + 1e-12)
    sigma = u @ (w_mat @ v)
    return w / sigma


def _init_conv(key, cout, cin, kh, kw, use_bias, use_sn):
    kw_key, kb_key, ksn_key = jax.random.split(key, 3)
    fan_in = cin * kh * kw
    w = jax.random.normal(kw_key, (cout, cin, kh, kw), jnp.float32) / jnp.sqrt(fan_in)
    if use_sn:
        w = spectral_normalize(w, ksn_key)
    b = (jax.random.normal(kb_key, (cout,), jnp.float32) * 0.01) if use_bias else None
    return w, b


def _pad_bias(b, cout, cout_pad):
    if b is None:
        return jnp.zeros((cout_pad,), jnp.float32)
    return jnp.pad(b, (0, cout_pad - cout)).astype(jnp.float32)


def _prep_conv(w, b, cout_pad):
    """[Cout,Cin,kh,kw] -> bf16 matmul weight [round_up(kh*kw*Cin,128), cout_pad]
    (K rows zero-padded once at init, matching _im2col) + f32 bias."""
    cout, cin, kh, kw = w.shape
    k_real = kh * kw * cin
    k_pad = _round_up(k_real, LANE)
    w_mat = jnp.transpose(w, (2, 3, 1, 0)).reshape(k_real, cout)
    w_mat = jnp.pad(w_mat, ((0, k_pad - k_real), (0, cout_pad - cout)))
    return w_mat.astype(jnp.bfloat16), _pad_bias(b, cout, cout_pad)


def _prep_skip(w, b, n_taps, cout_pad):
    """1x1-conv weight [Cout,Cin,1,1] -> block-diagonal bf16 weight
    [round_up(n_taps*Cin,128), n_taps*cout_pad] so all taps of the fused
    MaxPool / `direct` path are computed by ONE small MXU dot."""
    cout, cin = w.shape[0], w.shape[1]
    w2 = jnp.pad(jnp.transpose(w.reshape(cout, cin), (1, 0)),
                 ((0, 0), (0, cout_pad - cout)))            # [Cin, N]
    kt_pad = _round_up(n_taps * cin, LANE)
    wt = jnp.zeros((kt_pad, n_taps * cout_pad), jnp.float32)
    for i in range(n_taps):
        wt = wt.at[i * cin:(i + 1) * cin, i * cout_pad:(i + 1) * cout_pad].set(w2)
    return wt.astype(jnp.bfloat16), _pad_bias(b, cout, cout_pad)


def init_discriminator(key, in_channels, hidden_channels, use_sn=True):
    k1, k2, k3, k4, k5 = jax.random.split(key, 5)
    cp_h = _round_up(hidden_channels, LANE)
    cp_h2 = _round_up(hidden_channels * 2, LANE)
    cp_h4 = _round_up(hidden_channels * 4, LANE)

    def block_params(bkey, cin, cout, cout_p, bias):
        ka, kb, kc = jax.random.split(bkey, 3)
        rw, rb = _init_conv(ka, cout, cin, 3, 3, bias, use_sn)
        dw, db = _init_conv(kb, cout, cout, 4, 4, bias, use_sn)
        sw, sb = _init_conv(kc, cout, cin, 1, 1, bias, use_sn)
        rwm, rbm = _prep_conv(rw, rb, cout_p)
        dwm, dbm = _prep_conv(dw, db, cout_p)
        swm, sbm = _prep_skip(sw, sb, 4, cout_p)
        return dict(res_w=rwm, res_b=rbm, down_w=dwm, down_b=dbm,
                    skip_w=swm, skip_b=sbm)

    params = {
        "block1": block_params(k1, in_channels, hidden_channels, cp_h, True),
        "block2": block_params(k2, hidden_channels, hidden_channels * 2,
                               cp_h2, False),
    }
    w1, _ = _init_conv(k3, hidden_channels * 4, hidden_channels * 2, 4, 4, False, use_sn)
    w2, _ = _init_conv(k4, 1, hidden_channels * 4, 4, 4, False, use_sn)
    wd, _ = _init_conv(k5, 1, hidden_channels * 2, 1, 1, False, use_sn)
    params["l2_w1"], params["l2_b1"] = _prep_conv(w1, None, cp_h4)
    params["l2_w2"], params["l2_b2"] = _prep_conv(w2, None, LANE)
    params["direct_w"], params["direct_b"] = _prep_skip(wd, None, 1, LANE)
    return params


# ------------------------------ Forward pass --------------------------------

def dis_block(x, p, cin, cout):
    """x: [B,H,W,C>=cin] bf16 (real channels are the prefix).
    Returns [B, H/2, W/2, round_up(cout,128)] bf16 (zero tail)."""
    B, H, W, _ = x.shape

    # residual branch: conv3x3 (reflect pad 1) + ReLU
    patches, (_, OH, OW) = _im2col(x, cin, 3, 3, 1, 1, "reflect")
    h = _fused_matmul(patches, p["res_w"], p["res_b"],
                      act="relu", out_dtype=jnp.bfloat16)
    h = h.reshape(B, OH, OW, -1)

    # fused: conv4x4(s=2, reflect pad 1) + LeakyReLU(0.2)
    #        + [skip: conv1x1 -> MaxPool2d(2,2)] + residual add
    patches_d, (_, OHd, OWd) = _im2col(h, cout, 4, 4, 2, 1, "reflect")
    # 2x2 max-pool windows of conv1x1(x): taps are x at (2oh+di, 2ow+dj),
    # packed with real channels only into a single 128-lane block.
    # (Assumes even H, W, matching PyTorch MaxPool2d(2,2) floor behaviour.)
    # TODO(synk): these strided gathers are still XLA glue; fold into the tap
    # BlockSpec index_map once im2col moves in-kernel.
    taps = jnp.concatenate(
        [x[:, di::2, dj::2, :cin].reshape(B * OHd * OWd, cin)
         for di in (0, 1) for dj in (0, 1)], axis=1)
    taps = _pad_axis(taps, 1, p["skip_w"].shape[0])
    out = _fused_matmul(patches_d, p["down_w"], p["down_b"],
                        act="leaky_relu", out_dtype=jnp.bfloat16,
                        taps=taps, w_taps=p["skip_w"], b_taps=p["skip_b"],
                        n_taps=4)
    return out.reshape(B, OHd, OWd, -1)


def discriminator_forward(params, x_nchw, y_nchw=None, *, in_channels,
                          hidden_channels):
    if y_nchw is not None:
        inp = jnp.concatenate([x_nchw, y_nchw], axis=1)
    else:
        inp = x_nchw
    x = jnp.transpose(inp, (0, 2, 3, 1)).astype(jnp.bfloat16)   # NCHW -> NHWC
    B = x.shape[0]

    # layer1: two DisBlocks
    out1 = dis_block(x, params["block1"], in_channels, hidden_channels)
    out1 = dis_block(out1, params["block2"], hidden_channels, hidden_channels * 2)
    c1 = hidden_channels * 2

    # layer2 (PatchGAN head): conv4x4(reflect pad 1) + ReLU
    patches1, (_, OH1, OW1) = _im2col(out1, c1, 4, 4, 1, 1, "reflect")
    h = _fused_matmul(patches1, params["l2_w1"], params["l2_b1"],
                      act="relu", out_dtype=jnp.bfloat16)
    h = h.reshape(B, OH1, OW1, -1)

    # fused: conv4x4(reflect pad 1) + ReLU + direct(out1)[..., 1:-1, 1:-1] add
    patches2, (_, OH2, OW2) = _im2col(h, hidden_channels * 4, 4, 4, 1, 1, "reflect")
    direct_taps = out1[:, 1:-1, 1:-1, :c1].reshape(B * OH2 * OW2, c1)
    direct_taps = _pad_axis(direct_taps, 1, params["direct_w"].shape[0])
    out = _fused_matmul(patches2, params["l2_w2"], params["l2_b2"],
                        act="relu", out_dtype=jnp.float32,
                        taps=direct_taps, w_taps=params["direct_w"],
                        b_taps=params["direct_b"], n_taps=1)
    out = out.reshape(B, OH2, OW2, -1)[:, :, :, :1]     # keep real Cout=1
    return jnp.transpose(out, (0, 3, 1, 2))             # NHWC -> NCHW


# ----------------------------------- main ------------------------------------

if __name__ == "__main__":
    key = jax.random.PRNGKey(0)
    k_par, k_x = jax.random.split(key)

    B, Cin, S = 2, 4, 16
    hidden = 8
    params = init_discriminator(k_par, Cin, hidden, use_sn=True)
    x = jax.random.normal(k_x, (B, Cin, S, S), jnp.float32)

    fwd = jax.jit(functools.partial(discriminator_forward,
                                    in_channels=Cin, hidden_channels=hidden))
    out = jax.block_until_ready(fwd(params, x))          # expected: (2, 1, 2, 2)
    assert out.shape == (B, 1, S // 4 - 2, S // 4 - 2), out.shape
    assert bool(jnp.all(jnp.isfinite(out)))
    print("KERNEL_OK")
</pallas_src>

<mosaic_0001>
module attributes {stable_mosaic.version = 11 : i64} {
  func.func @_mm1_kernel(%arg0: i32, %arg1: memref<256x128xbf16, #tpu.memory_space<vmem>>, %arg2: memref<128x128xbf16, #tpu.memory_space<vmem>>, %arg3: memref<1x128xf32, #tpu.memory_space<vmem>>, %arg4: memref<256x128xbf16, #tpu.memory_space<vmem>>) attributes {dimension_semantics = [#tpu.dimension_semantics<parallel>], iteration_bounds = array<i64: 2>, scalar_prefetch = 0 : i64, scratch_operands = 0 : i64, tpu.core_type = #tpu.core_type<tc>, window_params = [{transform_indices = @transform_0, window_bounds = array<i64: 256, 128>}, {pipeline_mode = #tpu.pipeline_mode<synchronous>, transform_indices = @transform_1, window_bounds = array<i64: 128, 128>}, {pipeline_mode = #tpu.pipeline_mode<synchronous>, transform_indices = @transform_2, window_bounds = array<i64: 1, 128>}, {transform_indices = @transform_3, window_bounds = array<i64: 256, 128>}]} {
    %c0 = arith.constant 0 : index
    %c0_0 = arith.constant 0 : index
    %0 = vector.load %arg1[%c0, %c0_0] : memref<256x128xbf16, #tpu.memory_space<vmem>>, vector<256x128xbf16>
    %c0_1 = arith.constant 0 : index
    %c0_2 = arith.constant 0 : index
    %1 = vector.load %arg2[%c0_1, %c0_2] : memref<128x128xbf16, #tpu.memory_space<vmem>>, vector<128x128xbf16>
    %cst = arith.constant dense<0.000000e+00> : vector<256x128xf32>
    %2 = tpu.matmul %0, %1, %cst {dimension_numbers = #tpu.dot_dimension_numbers<[1], [0], [0], [1], [0, 0, 1, 1], [], []>} : vector<256x128xbf16>, vector<128x128xbf16>, vector<256x128xf32> -> vector<256x128xf32>
    %c0_3 = arith.constant 0 : index
    %c0_4 = arith.constant 0 : index
    %3 = vector.load %arg3[%c0_3, %c0_4] : memref<1x128xf32, #tpu.memory_space<vmem>>, vector<1x128xf32>
    %4 = vector.broadcast %3 : vector<1x128xf32> to vector<256x128xf32>
    %5 = arith.addf %2, %4 : vector<256x128xf32>
    %cst_5 = arith.constant 0.000000e+00 : f32
    %6 = vector.broadcast %cst_5 : f32 to vector<256x128xf32>
    %7 = arith.maximumf %5, %6 : vector<256x128xf32>
    %8 = arith.truncf %7 : vector<256x128xf32> to vector<256x128xbf16>
    %c0_6 = arith.constant 0 : index
    %c0_7 = arith.constant 0 : index
    %9 = vector.load %arg4[%c0_6, %c0_7] : memref<256x128xbf16, #tpu.memory_space<vmem>>, vector<256x128xbf16>
    tpu.vector_store %arg4[%c0_6, %c0_7], %8 {strides = array<i32>} : memref<256x128xbf16, #tpu.memory_space<vmem>>, vector<256x128xbf16>,
    return
  }
  func.func @transform_0(%arg0: i32) -> (i32, i32) {
    %c0_i32 = arith.constant 0 : i32
    %c0_i32_0 = arith.constant 0 : i32
    return %arg0, %c0_i32 : i32, i32
  }
  func.func @transform_1(%arg0: i32) -> (i32, i32) {
    %c0_i32 = arith.constant 0 : i32
    %c0_i32_0 = arith.constant 0 : i32
    %c0_i32_1 = arith.constant 0 : i32
    return %c0_i32, %c0_i32_0 : i32, i32
  }
  func.func @transform_2(%arg0: i32) -> (i32, i32) {
    %c0_i32 = arith.constant 0 : i32
    %c0_i32_0 = arith.constant 0 : i32
    %c0_i32_1 = arith.constant 0 : i32
    return %c0_i32, %c0_i32_0 : i32, i32
  }
  func.func @transform_3(%arg0: i32) -> (i32, i32) {
    %c0_i32 = arith.constant 0 : i32
    %c0_i32_0 = arith.constant 0 : i32
    return %arg0, %c0_i32 : i32, i32
  }
}

module attributes {stable_mosaic.version = 11 : i64} {
  func.func @_mm1_extra_kernel(%arg0: i32, %arg1: memref<64x128xbf16, #tpu.memory_space<vmem>>, %arg2: memref<128x128xbf16, #tpu.memory_space<vmem>>, %arg3: memref<1x128xf32, #tpu.memory_space<vmem>>, %arg4: memref<64x128xbf16, #tpu.memory_space<vmem>>, %arg5: memref<128x512xbf16, #tpu.memory_space<vmem>>, %arg6: memref<1x128xf32, #tpu.memory_space<vmem>>, %arg7: memref<64x128xbf16, #tpu.memory_space<vmem>>) attributes {dimension_semantics = [#tpu.dimension_semantics<parallel>], iteration_bounds = array<i64: 2>, scalar_prefetch = 0 : i64, scratch_operands = 0 : i64, tpu.core_type = #tpu.core_type<tc>, window_params = [{transform_indices = @transform_0, window_bounds = array<i64: 64, 128>}, {pipeline_mode = #tpu.pipeline_mode<synchronous>, transform_indices = @transform_1, window_bounds = array<i64: 128, 128>}, {pipeline_mode = #tpu.pipeline_mode<synchronous>, transform_indices = @transform_2, window_bounds = array<i64: 1, 128>}, {transform_indices = @transform_3, window_bounds = array<i64: 64, 128>}, {pipeline_mode = #tpu.pipeline_mode<synchronous>, transform_indices = @transform_4, window_bounds = array<i64: 128, 512>}, {pipeline_mode = #tpu.pipeline_mode<synchronous>, transform_indices = @transform_5, window_bounds = array<i64: 1, 128>}, {transform_indices = @transform_6, window_bounds = array<i64: 64, 128>}]} {
    %c0 = arith.constant 0 : index
    %c0_0 = arith.constant 0 : index
    %0 = vector.load %arg1[%c0, %c0_0] : memref<64x128xbf16, #tpu.memory_space<vmem>>, vector<64x128xbf16>
    %c0_1 = arith.constant 0 : index
    %c0_2 = arith.constant 0 : index
    %1 = vector.load %arg2[%c0_1, %c0_2] : memref<128x128xbf16, #tpu.memory_space<vmem>>, vector<128x128xbf16>
    %cst = arith.constant dense<0.000000e+00> : vector<64x128xf32>
    %2 = tpu.matmul %0, %1, %cst {dimension_numbers = #tpu.dot_dimension_numbers<[1], [0], [0], [1], [0, 0, 1, 1], [], []>} : vector<64x128xbf16>, vector<128x128xbf16>, vector<64x128xf32> -> vector<64x128xf32>
    %c0_3 = arith.constant 0 : index
    %c0_4 = arith.constant 0 : index
    %3 = vector.load %arg3[%c0_3, %c0_4] : memref<1x128xf32, #tpu.memory_space<vmem>>, vector<1x128xf32>
    %4 = vector.broadcast %3 : vector<1x128xf32> to vector<64x128xf32>
    %5 = arith.addf %2, %4 : vector<64x128xf32>
    %cst_5 = arith.constant 2.000000e-01 : f32
    %6 = vector.broadcast %cst_5 : f32 to vector<64x128xf32>
    %7 = arith.mulf %6, %5 : vector<64x128xf32>
    %8 = arith.maximumf %5, %7 : vector<64x128xf32>
    %c0_6 = arith.constant 0 : index
    %c0_7 = arith.constant 0 : index
    %9 = vector.load %arg4[%c0_6, %c0_7] : memref<64x128xbf16, #tpu.memory_space<vmem>>, vector<64x128xbf16>
    %c0_8 = arith.constant 0 : index
    %c0_9 = arith.constant 0 : index
    %10 = vector.load %arg5[%c0_8, %c0_9] : memref<128x512xbf16, #tpu.memory_space<vmem>>, vector<128x512xbf16>
    %cst_10 = arith.constant dense<0.000000e+00> : vector<64x512xf32>
    %11 = tpu.matmul %9, %10, %cst_10 {dimension_numbers = #tpu.dot_dimension_numbers<[1], [0], [0], [1], [0, 0, 1, 1], [], []>} : vector<64x128xbf16>, vector<128x512xbf16>, vector<64x512xf32> -> vector<64x512xf32>
    %12 = vector.extract_strided_slice %11 {offsets = [0, 0], sizes = [64, 128], strides = [1, 1]} : vector<64x512xf32> to vector<64x128xf32>
    %13 = vector.extract_strided_slice %11 {offsets = [0, 128], sizes = [64, 128], strides = [1, 1]} : vector<64x512xf32> to vector<64x128xf32>
    %14 = arith.maximumf %12, %13 : vector<64x128xf32>
    %15 = vector.extract_strided_slice %11 {offsets = [0, 256], sizes = [64, 128], strides = [1, 1]} : vector<64x512xf32> to vector<64x128xf32>
    %16 = arith.maximumf %14, %15 : vector<64x128xf32>
    %17 = vector.extract_strided_slice %11 {offsets = [0, 384], sizes = [64, 128], strides = [1, 1]} : vector<64x512xf32> to vector<64x128xf32>
    %18 = arith.maximumf %16, %17 : vector<64x128xf32>
    %19 = arith.addf %8, %18 : vector<64x128xf32>
    %c0_11 = arith.constant 0 : index
    %c0_12 = arith.constant 0 : index
    %20 = vector.load %arg6[%c0_11, %c0_12] : memref<1x128xf32, #tpu.memory_space<vmem>>, vector<1x128xf32>
    %21 = vector.broadcast %20 : vector<1x128xf32> to vector<64x128xf32>
    %22 = arith.addf %19, %21 : vector<64x128xf32>
    %23 = arith.truncf %22 : vector<64x128xf32> to vector<64x128xbf16>
    %c0_13 = arith.constant 0 : index
    %c0_14 = arith.constant 0 : index
    %24 = vector.load %arg7[%c0_13, %c0_14] : memref<64x128xbf16, #tpu.memory_space<vmem>>, vector<64x128xbf16>
    tpu.vector_store %arg7[%c0_13, %c0_14], %23 {strides = array<i32>} : memref<64x128xbf16, #tpu.memory_space<vmem>>, vector<64x128xbf16>,
    return
  }
  func.func @transform_0(%arg0: i32) -> (i32, i32) {
    %c0_i32 = arith.constant 0 : i32
    %c0_i32_0 = arith.constant 0 : i32
    return %arg0, %c0_i32 : i32, i32
  }
  func.func @transform_1(%arg0: i32) -> (i32, i32) {
    %c0_i32 = arith.constant 0 : i32
    %c0_i32_0 = arith.constant 0 : i32
    %c0_i32_1 = arith.constant 0 : i32
    return %c0_i32, %c0_i32_0 : i32, i32
  }
  func.func @transform_2(%arg0: i32) -> (i32, i32) {
    %c0_i32 = arith.constant 0 : i32
    %c0_i32_0 = arith.constant 0 : i32
    %c0_i32_1 = arith.constant 0 : i32
    return %c0_i32, %c0_i32_0 : i32, i32
  }
  func.func @transform_3(%arg0: i32) -> (i32, i32) {
    %c0_i32 = arith.constant 0 : i32
    %c0_i32_0 = arith.constant 0 : i32
    return %arg0, %c0_i32 : i32, i32
  }
  func.func @transform_4(%arg0: i32) -> (i32, i32) {
    %c0_i32 = arith.constant 0 : i32
    %c0_i32_0 = arith.constant 0 : i32
    %c0_i32_1 = arith.constant 0 : i32
    return %c0_i32, %c0_i32_0 : i32, i32
  }
  func.func @transform_5(%arg0: i32) -> (i32, i32) {
    %c0_i32 = arith.constant 0 : i32
    %c0_i32_0 = arith.constant 0 : i32
    %c0_i32_1 = arith.constant 0 : i32
    return %c0_i32, %c0_i32_0 : i32, i32
  }
  func.func @transform_6(%arg0: i32) -> (i32, i32) {
    %c0_i32 = arith.constant 0 : i32
    %c0_i32_0 = arith.constant 0 : i32
    return %arg0, %c0_i32 : i32, i32
  }
}

module attributes {stable_mosaic.version = 11 : i64} {
  func.func @_mm1_kernel(%arg0: i32, %arg1: memref<64x128xbf16, #tpu.memory_space<vmem>>, %arg2: memref<128x128xbf16, #tpu.memory_space<vmem>>, %arg3: memref<1x128xf32, #tpu.memory_space<vmem>>, %arg4: memref<64x128xbf16, #tpu.memory_space<vmem>>) attributes {dimension_semantics = [#tpu.dimension_semantics<parallel>], iteration_bounds = array<i64: 2>, scalar_prefetch = 0 : i64, scratch_operands = 0 : i64, tpu.core_type = #tpu.core_type<tc>, window_params = [{transform_indices = @transform_0, window_bounds = array<i64: 64, 128>}, {pipeline_mode = #tpu.pipeline_mode<synchronous>, transform_indices = @transform_1, window_bounds = array<i64: 128, 128>}, {pipeline_mode = #tpu.pipeline_mode<synchronous>, transform_indices = @transform_2, window_bounds = array<i64: 1, 128>}, {transform_indices = @transform_3, window_bounds = array<i64: 64, 128>}]} {
    %c0 = arith.constant 0 : index
    %c0_0 = arith.constant 0 : index
    %0 = vector.load %arg1[%c0, %c0_0] : memref<64x128xbf16, #tpu.memory_space<vmem>>, vector<64x128xbf16>
    %c0_1 = arith.constant 0 : index
    %c0_2 = arith.constant 0 : index
    %1 = vector.load %arg2[%c0_1, %c0_2] : memref<128x128xbf16, #tpu.memory_space<vmem>>, vector<128x128xbf16>
    %cst = arith.constant dense<0.000000e+00> : vector<64x128xf32>
    %2 = tpu.matmul %0, %1, %cst {dimension_numbers = #tpu.dot_dimension_numbers<[1], [0], [0], [1], [0, 0, 1, 1], [], []>} : vector<64x128xbf16>, vector<128x128xbf16>, vector<64x128xf32> -> vector<64x128xf32>
    %c0_3 = arith.constant 0 : index
    %c0_4 = arith.constant 0 : index
    %3 = vector.load %arg3[%c0_3, %c0_4] : memref<1x128xf32, #tpu.memory_space<vmem>>, vector<1x128xf32>
    %4 = vector.broadcast %3 : vector<1x128xf32> to vector<64x128xf32>
    %5 = arith.addf %2, %4 : vector<64x128xf32>
    %cst_5 = arith.constant 0.000000e+00 : f32
    %6 = vector.broadcast %cst_5 : f32 to vector<64x128xf32>
    %7 = arith.maximumf %5, %6 : vector<64x128xf32>
    %8 = arith.truncf %7 : vector<64x128xf32> to vector<64x128xbf16>
    %c0_6 = arith.constant 0 : index
    %c0_7 = arith.constant 0 : index
    %9 = vector.load %arg4[%c0_6, %c0_7] : memref<64x128xbf16, #tpu.memory_space<vmem>>, vector<64x128xbf16>
    tpu.vector_store %arg4[%c0_6, %c0_7], %8 {strides = array<i32>} : memref<64x128xbf16, #tpu.memory_space<vmem>>, vector<64x128xbf16>,
    return
  }
  func.func @transform_0(%arg0: i32) -> (i32, i32) {
    %c0_i32 = arith.constant 0 : i32
    %c0_i32_0 = arith.constant 0 : i32
    return %arg0, %c0_i32 : i32, i32
  }
  func.func @transform_1(%arg0: i32) -> (i32, i32) {
    %c0_i32 = arith.constant 0 : i32
    %c0_i32_0 = arith.constant 0 : i32
    %c0_i32_1 = arith.constant 0 : i32
    return %c0_i32, %c0_i32_0 : i32, i32
  }
  func.func @transform_2(%arg0: i32) -> (i32, i32) {
    %c0_i32 = arith.constant 0 : i32
    %c0_i32_0 = arith.constant 0 : i32
    %c0_i32_1 = arith.constant 0 : i32
    return %c0_i32, %c0_i32_0 : i32, i32
  }
  func.func @transform_3(%arg0: i32) -> (i32, i32) {
    %c0_i32 = arith.constant 0 : i32
    %c0_i32_0 = arith.constant 0 : i32
    return %arg0, %c0_i32 : i32, i32
  }
}

module attributes {stable_mosaic.version = 11 : i64} {
  func.func @_mm1_extra_kernel(%arg0: i32, %arg1: memref<16x256xbf16, #tpu.memory_space<vmem>>, %arg2: memref<256x128xbf16, #tpu.memory_space<vmem>>, %arg3: memref<1x128xf32, #tpu.memory_space<vmem>>, %arg4: memref<16x128xbf16, #tpu.memory_space<vmem>>, %arg5: memref<128x512xbf16, #tpu.memory_space<vmem>>, %arg6: memref<1x128xf32, #tpu.memory_space<vmem>>, %arg7: memref<16x128xbf16, #tpu.memory_space<vmem>>) attributes {dimension_semantics = [#tpu.dimension_semantics<parallel>], iteration_bounds = array<i64: 2>, scalar_prefetch = 0 : i64, scratch_operands = 0 : i64, tpu.core_type = #tpu.core_type<tc>, window_params = [{transform_indices = @transform_0, window_bounds = array<i64: 16, 256>}, {pipeline_mode = #tpu.pipeline_mode<synchronous>, transform_indices = @transform_1, window_bounds = array<i64: 256, 128>}, {pipeline_mode = #tpu.pipeline_mode<synchronous>, transform_indices = @transform_2, window_bounds = array<i64: 1, 128>}, {transform_indices = @transform_3, window_bounds = array<i64: 16, 128>}, {pipeline_mode = #tpu.pipeline_mode<synchronous>, transform_indices = @transform_4, window_bounds = array<i64: 128, 512>}, {pipeline_mode = #tpu.pipeline_mode<synchronous>, transform_indices = @transform_5, window_bounds = array<i64: 1, 128>}, {transform_indices = @transform_6, window_bounds = array<i64: 16, 128>}]} {
    %c0 = arith.constant 0 : index
    %c0_0 = arith.constant 0 : index
    %0 = vector.load %arg1[%c0, %c0_0] : memref<16x256xbf16, #tpu.memory_space<vmem>>, vector<16x256xbf16>
    %c0_1 = arith.constant 0 : index
    %c0_2 = arith.constant 0 : index
    %1 = vector.load %arg2[%c0_1, %c0_2] : memref<256x128xbf16, #tpu.memory_space<vmem>>, vector<256x128xbf16>
    %cst = arith.constant dense<0.000000e+00> : vector<16x128xf32>
    %2 = tpu.matmul %0, %1, %cst {dimension_numbers = #tpu.dot_dimension_numbers<[1], [0], [0], [1], [0, 0, 1, 1], [], []>} : vector<16x256xbf16>, vector<256x128xbf16>, vector<16x128xf32> -> vector<16x128xf32>
    %c0_3 = arith.constant 0 : index
    %c0_4 = arith.constant 0 : index
    %3 = vector.load %arg3[%c0_3, %c0_4] : memref<1x128xf32, #tpu.memory_space<vmem>>, vector<1x128xf32>
    %4 = vector.broadcast %3 : vector<1x128xf32> to vector<16x128xf32>
    %5 = arith.addf %2, %4 : vector<16x128xf32>
    %cst_5 = arith.constant 2.000000e-01 : f32
    %6 = vector.broadcast %cst_5 : f32 to vector<16x128xf32>
    %7 = arith.mulf %6, %5 : vector<16x128xf32>
    %8 = arith.maximumf %5, %7 : vector<16x128xf32>
    %c0_6 = arith.constant 0 : index
    %c0_7 = arith.constant 0 : index
    %9 = vector.load %arg4[%c0_6, %c0_7] : memref<16x128xbf16, #tpu.memory_space<vmem>>, vector<16x128xbf16>
    %c0_8 = arith.constant 0 : index
    %c0_9 = arith.constant 0 : index
    %10 = vector.load %arg5[%c0_8, %c0_9] : memref<128x512xbf16, #tpu.memory_space<vmem>>, vector<128x512xbf16>
    %cst_10 = arith.constant dense<0.000000e+00> : vector<16x512xf32>
    %11 = tpu.matmul %9, %10, %cst_10 {dimension_numbers = #tpu.dot_dimension_numbers<[1], [0], [0], [1], [0, 0, 1, 1], [], []>} : vector<16x128xbf16>, vector<128x512xbf16>, vector<16x512xf32> -> vector<16x512xf32>
    %12 = vector.extract_strided_slice %11 {offsets = [0, 0], sizes = [16, 128], strides = [1, 1]} : vector<16x512xf32> to vector<16x128xf32>
    %13 = vector.extract_strided_slice %11 {offsets = [0, 128], sizes = [16, 128], strides = [1, 1]} : vector<16x512xf32> to vector<16x128xf32>
    %14 = arith.maximumf %12, %13 : vector<16x128xf32>
    %15 = vector.extract_strided_slice %11 {offsets = [0, 256], sizes = [16, 128], strides = [1, 1]} : vector<16x512xf32> to vector<16x128xf32>
    %16 = arith.maximumf %14, %15 : vector<16x128xf32>
    %17 = vector.extract_strided_slice %11 {offsets = [0, 384], sizes = [16, 128], strides = [1, 1]} : vector<16x512xf32> to vector<16x128xf32>
    %18 = arith.maximumf %16, %17 : vector<16x128xf32>
    %19 = arith.addf %8, %18 : vector<16x128xf32>
    %c0_11 = arith.constant 0 : index
    %c0_12 = arith.constant 0 : index
    %20 = vector.load %arg6[%c0_11, %c0_12] : memref<1x128xf32, #tpu.memory_space<vmem>>, vector<1x128xf32>
    %21 = vector.broadcast %20 : vector<1x128xf32> to vector<16x128xf32>
    %22 = arith.addf %19, %21 : vector<16x128xf32>
    %23 = arith.truncf %22 : vector<16x128xf32> to vector<16x128xbf16>
    %c0_13 = arith.constant 0 : index
    %c0_14 = arith.constant 0 : index
    %24 = vector.load %arg7[%c0_13, %c0_14] : memref<16x128xbf16, #tpu.memory_space<vmem>>, vector<16x128xbf16>
    tpu.vector_store %arg7[%c0_13, %c0_14], %23 {strides = array<i32>} : memref<16x128xbf16, #tpu.memory_space<vmem>>, vector<16x128xbf16>,
    return
  }
  func.func @transform_0(%arg0: i32) -> (i32, i32) {
    %c0_i32 = arith.constant 0 : i32
    %c0_i32_0 = arith.constant 0 : i32
    return %arg0, %c0_i32 : i32, i32
  }
  func.func @transform_1(%arg0: i32) -> (i32, i32) {
    %c0_i32 = arith.constant 0 : i32
    %c0_i32_0 = arith.constant 0 : i32
    %c0_i32_1 = arith.constant 0 : i32
    return %c0_i32, %c0_i32_0 : i32, i32
  }
  func.func @transform_2(%arg0: i32) -> (i32, i32) {
    %c0_i32 = arith.constant 0 : i32
    %c0_i32_0 = arith.constant 0 : i32
    %c0_i32_1 = arith.constant 0 : i32
    return %c0_i32, %c0_i32_0 : i32, i32
  }
  func.func @transform_3(%arg0: i32) -> (i32, i32) {
    %c0_i32 = arith.constant 0 : i32
    %c0_i32_0 = arith.constant 0 : i32
    return %arg0, %c0_i32 : i32, i32
  }
  func.func @transform_4(%arg0: i32) -> (i32, i32) {
    %c0_i32 = arith.constant 0 : i32
    %c0_i32_0 = arith.constant 0 : i32
    %c0_i32_1 = arith.constant 0 : i32
    return %c0_i32, %c0_i32_0 : i32, i32
  }
  func.func @transform_5(%arg0: i32) -> (i32, i32) {
    %c0_i32 = arith.constant 0 : i32
    %c0_i32_0 = arith.constant 0 : i32
    %c0_i32_1 = arith.constant 0 : i32
    return %c0_i32, %c0_i32_0 : i32, i32
  }
  func.func @transform_6(%arg0: i32) -> (i32, i32) {
    %c0_i32 = arith.constant 0 : i32
    %c0_i32_0 = arith.constant 0 : i32
    return %arg0, %c0_i32 : i32, i32
  }
}

module attributes {stable_mosaic.version = 11 : i64} {
  func.func @_mm1_kernel(%arg0: i32, %arg1: memref<32x256xbf16, #tpu.memory_space<vmem>>, %arg2: memref<256x128xbf16, #tpu.memory_space<vmem>>, %arg3: memref<1x128xf32, #tpu.memory_space<vmem>>, %arg4: memref<32x128xbf16, #tpu.memory_space<vmem>>) attributes {dimension_semantics = [#tpu.dimension_semantics<parallel>], iteration_bounds = array<i64: 1>, scalar_prefetch = 0 : i64, scratch_operands = 0 : i64, tpu.core_type = #tpu.core_type<tc>, window_params = [{transform_indices = @transform_0, window_bounds = array<i64: 32, 256>}, {pipeline_mode = #tpu.pipeline_mode<synchronous>, transform_indices = @transform_1, window_bounds = array<i64: 256, 128>}, {pipeline_mode = #tpu.pipeline_mode<synchronous>, transform_indices = @transform_2, window_bounds = array<i64: 1, 128>}, {transform_indices = @transform_3, window_bounds = array<i64: 32, 128>}]} {
    %c0 = arith.constant 0 : index
    %c0_0 = arith.constant 0 : index
    %0 = vector.load %arg1[%c0, %c0_0] : memref<32x256xbf16, #tpu.memory_space<vmem>>, vector<32x256xbf16>
    %c0_1 = arith.constant 0 : index
    %c0_2 = arith.constant 0 : index
    %1 = vector.load %arg2[%c0_1, %c0_2] : memref<256x128xbf16, #tpu.memory_space<vmem>>, vector<256x128xbf16>
    %cst = arith.constant dense<0.000000e+00> : vector<32x128xf32>
    %2 = tpu.matmul %0, %1, %cst {dimension_numbers = #tpu.dot_dimension_numbers<[1], [0], [0], [1], [0, 0, 1, 1], [], []>} : vector<32x256xbf16>, vector<256x128xbf16>, vector<32x128xf32> -> vector<32x128xf32>
    %c0_3 = arith.constant 0 : index
    %c0_4 = arith.constant 0 : index
    %3 = vector.load %arg3[%c0_3, %c0_4] : memref<1x128xf32, #tpu.memory_space<vmem>>, vector<1x128xf32>
    %4 = vector.broadcast %3 : vector<1x128xf32> to vector<32x128xf32>
    %5 = arith.addf %2, %4 : vector<32x128xf32>
    %cst_5 = arith.constant 0.000000e+00 : f32
    %6 = vector.broadcast %cst_5 : f32 to vector<32x128xf32>
    %7 = arith.maximumf %5, %6 : vector<32x128xf32>
    %8 = arith.truncf %7 : vector<32x128xf32> to vector<32x128xbf16>
    %c0_6 = arith.constant 0 : index
    %c0_7 = arith.constant 0 : index
    %9 = vector.load %arg4[%c0_6, %c0_7] : memref<32x128xbf16, #tpu.memory_space<vmem>>, vector<32x128xbf16>
    tpu.vector_store %arg4[%c0_6, %c0_7], %8 {strides = array<i32>} : memref<32x128xbf16, #tpu.memory_space<vmem>>, vector<32x128xbf16>,
    return
  }
  func.func @transform_0(%arg0: i32) -> (i32, i32) {
    %c0_i32 = arith.constant 0 : i32
    %c0_i32_0 = arith.constant 0 : i32
    return %arg0, %c0_i32 : i32, i32
  }
  func.func @transform_1(%arg0: i32) -> (i32, i32) {
    %c0_i32 = arith.constant 0 : i32
    %c0_i32_0 = arith.constant 0 : i32
    %c0_i32_1 = arith.constant 0 : i32
    return %c0_i32, %c0_i32_0 : i32, i32
  }
  func.func @transform_2(%arg0: i32) -> (i32, i32) {
    %c0_i32 = arith.constant 0 : i32
    %c0_i32_0 = arith.constant 0 : i32
    %c0_i32_1 = arith.constant 0 : i32
    return %c0_i32, %c0_i32_0 : i32, i32
  }
  func.func @transform_3(%arg0: i32) -> (i32, i32) {
    %c0_i32 = arith.constant 0 : i32
    %c0_i32_0 = arith.constant 0 : i32
    return %arg0, %c0_i32 : i32, i32
  }
}

module attributes {stable_mosaic.version = 11 : i64} {
  func.func @_mm1_extra_kernel(%arg0: i32, %arg1: memref<8x512xbf16, #tpu.memory_space<vmem>>, %arg2: memref<512x128xbf16, #tpu.memory_space<vmem>>, %arg3: memref<1x128xf32, #tpu.memory_space<vmem>>, %arg4: memref<8x128xbf16, #tpu.memory_space<vmem>>, %arg5: memref<128x128xbf16, #tpu.memory_space<vmem>>, %arg6: memref<1x128xf32, #tpu.memory_space<vmem>>, %arg7: memref<8x128xf32, #tpu.memory_space<vmem>>) attributes {dimension_semantics = [#tpu.dimension_semantics<parallel>], iteration_bounds = array<i64: 1>, scalar_prefetch = 0 : i64, scratch_operands = 0 : i64, tpu.core_type = #tpu.core_type<tc>, window_params = [{transform_indices = @transform_0, window_bounds = array<i64: 8, 512>}, {pipeline_mode = #tpu.pipeline_mode<synchronous>, transform_indices = @transform_1, window_bounds = array<i64: 512, 128>}, {pipeline_mode = #tpu.pipeline_mode<synchronous>, transform_indices = @transform_2, window_bounds = array<i64: 1, 128>}, {transform_indices = @transform_3, window_bounds = array<i64: 8, 128>}, {pipeline_mode = #tpu.pipeline_mode<synchronous>, transform_indices = @transform_4, window_bounds = array<i64: 128, 128>}, {pipeline_mode = #tpu.pipeline_mode<synchronous>, transform_indices = @transform_5, window_bounds = array<i64: 1, 128>}, {transform_indices = @transform_6, window_bounds = array<i64: 8, 128>}]} {
    %c0 = arith.constant 0 : index
    %c0_0 = arith.constant 0 : index
    %0 = vector.load %arg1[%c0, %c0_0] : memref<8x512xbf16, #tpu.memory_space<vmem>>, vector<8x512xbf16>
    %c0_1 = arith.constant 0 : index
    %c0_2 = arith.constant 0 : index
    %1 = vector.load %arg2[%c0_1, %c0_2] : memref<512x128xbf16, #tpu.memory_space<vmem>>, vector<512x128xbf16>
    %cst = arith.constant dense<0.000000e+00> : vector<8x128xf32>
    %2 = tpu.matmul %0, %1, %cst {dimension_numbers = #tpu.dot_dimension_numbers<[1], [0], [0], [1], [0, 0, 1, 1], [], []>} : vector<8x512xbf16>, vector<512x128xbf16>, vector<8x128xf32> -> vector<8x128xf32>
    %c0_3 = arith.constant 0 : index
    %c0_4 = arith.constant 0 : index
    %3 = vector.load %arg3[%c0_3, %c0_4] : memref<1x128xf32, #tpu.memory_space<vmem>>, vector<1x128xf32>
    %4 = vector.broadcast %3 : vector<1x128xf32> to vector<8x128xf32>
    %5 = arith.addf %2, %4 : vector<8x128xf32>
    %cst_5 = arith.constant 0.000000e+00 : f32
    %6 = vector.broadcast %cst_5 : f32 to vector<8x128xf32>
    %7 = arith.maximumf %5, %6 : vector<8x128xf32>
    %c0_6 = arith.constant 0 : index
    %c0_7 = arith.constant 0 : index
    %8 = vector.load %arg4[%c0_6, %c0_7] : memref<8x128xbf16, #tpu.memory_space<vmem>>, vector<8x128xbf16>
    %c0_8 = arith.constant 0 : index
    %c0_9 = arith.constant 0 : index
    %9 = vector.load %arg5[%c0_8, %c0_9] : memref<128x128xbf16, #tpu.memory_space<vmem>>, vector<128x128xbf16>
    %cst_10 = arith.constant dense<0.000000e+00> : vector<8x128xf32>
    %10 = tpu.matmul %8, %9, %cst_10 {dimension_numbers = #tpu.dot_dimension_numbers<[1], [0], [0], [1], [0, 0, 1, 1], [], []>} : vector<8x128xbf16>, vector<128x128xbf16>, vector<8x128xf32> -> vector<8x128xf32>
    %11 = arith.addf %7, %10 : vector<8x128xf32>
    %c0_11 = arith.constant 0 : index
    %c0_12 = arith.constant 0 : index
    %12 = vector.load %arg6[%c0_11, %c0_12] : memref<1x128xf32, #tpu.memory_space<vmem>>, vector<1x128xf32>
    %13 = vector.broadcast %12 : vector<1x128xf32> to vector<8x128xf32>
    %14 = arith.addf %11, %13 : vector<8x128xf32>
    %c0_13 = arith.constant 0 : index
    %c0_14 = arith.constant 0 : index
    %15 = vector.load %arg7[%c0_13, %c0_14] : memref<8x128xf32, #tpu.memory_space<vmem>>, vector<8x128xf32>
    tpu.vector_store %arg7[%c0_13, %c0_14], %14 {strides = array<i32>} : memref<8x128xf32, #tpu.memory_space<vmem>>, vector<8x128xf32>,
    return
  }
  func.func @transform_0(%arg0: i32) -> (i32, i32) {
    %c0_i32 = arith.constant 0 : i32
    %c0_i32_0 = arith.constant 0 : i32
    return %arg0, %c0_i32 : i32, i32
  }
  func.func @transform_1(%arg0: i32) -> (i32, i32) {
    %c0_i32 = arith.constant 0 : i32
    %c0_i32_0 = arith.constant 0 : i32
    %c0_i32_1 = arith.constant 0 : i32
    return %c0_i32, %c0_i32_0 : i32, i32
  }
  func.func @transform_2(%arg0: i32) -> (i32, i32) {
    %c0_i32 = arith.constant 0 : i32
    %c0_i32_0 = arith.constant 0 : i32
    %c0_i32_1 = arith.constant 0 : i32
    return %c0_i32, %c0_i32_0 : i32, i32
  }
  func.func @transform_3(%arg0: i32) -> (i32, i32) {
    %c0_i32 = arith.constant 0 : i32
    %c0_i32_0 = arith.constant 0 : i32
    return %arg0, %c0_i32 : i32, i32
  }
  func.func @transform_4(%arg0: i32) -> (i32, i32) {
    %c0_i32 = arith.constant 0 : i32
    %c0_i32_0 = arith.constant 0 : i32
    %c0_i32_1 = arith.constant 0 : i32
    return %c0_i32, %c0_i32_0 : i32, i32
  }
  func.func @transform_5(%arg0: i32) -> (i32, i32) {
    %c0_i32 = arith.constant 0 : i32
    %c0_i32_0 = arith.constant 0 : i32
    %c0_i32_1 = arith.constant 0 : i32
    return %c0_i32, %c0_i32_0 : i32, i32
  }
  func.func @transform_6(%arg0: i32) -> (i32, i32) {
    %c0_i32 = arith.constant 0 : i32
    %c0_i32_0 = arith.constant 0 : i32
    return %arg0, %c0_i32 : i32, i32
  }
}

</mosaic_0001>

<bundles_post_ra>
// kernel: discriminator_forward.6
= control target key start
LH: loop header
LB: loop body
LE: loop exit
PB: predicated region body
PF: predicated region fallthrough
CT: control target
= control target key end

     0   :  { %s1126_s12 = smov 0   ;;  %s1247_s0 = inlined_call_operand.vmem [shape: bf16[512,128], index: 0, kind: input, shape index: {}]   ;;  %s1248_s1 = inlined_call_operand.vmem [shape: bf16[128,128], index: 1, kind: input, shape index: {}]   ;;  %s1249_s2 = inlined_call_operand.vmem [shape: f32[1,128], index: 2, kind: input, shape index: {}]   ;;  %s1250_s3 = inlined_call_operand.vmem [shape: bf16[512,128], index: 3, kind: output, shape index: {}]  }
   0x1 LB: > { %s783_s13 = sadd.s32 4294967295, %s1104_s12   ;;  %p787_p0 = scmp.ge.s32.totalorder %s1104_s12, 1  ;;  %s1104_s12 = sphi %s1126_s12, %s13_s12  }
   0x2   : > { %p138_p1 = scmp.lt.s32.totalorder %s1104_s12, 3 }
   0x4   : > { %p139_p2 = pnand %p787_p0, %p138_p1 }
   0x5   : > { %v1074_v0 = vld [vmem:[%s1248_s1] sm:$0xff] (!%p139_p2)   ;;  %s788_s16 = sshll.u32 (!%p139_p2), %s783_s13, 5  ;;  %v1075_v1 = vld [vmem:[%s1248_s1 + $0x8] sm:$0xff] (!%p139_p2)   ;;  %v1076_v2 = vld [vmem:[%s1248_s1 + $0x10] sm:$0xff] (!%p139_p2)  }
   0x6   : > { %142 = sbr.rel (%p139_p2) target bundleno = 284 (0x11c), region = 32  ;;  %p163_p3 = scmp.lt.s32.totalorder (!%p139_p2), %s788_s16, 63  ;;  %1002 = vmatprep.subr.bf16.mxu0 (!%p139_p2), %v1074_v0  ;;  %1050 = vmatprep.subr.bf16.mxu1 (!%p139_p2), %v1074_v0  ;;  %v1077_v3 = vld [vmem:[%s1248_s1 + $0x18] sm:$0xff] (!%p139_p2)   ;;  %v1078_v6 = vld [vmem:[%s1248_s1 + $0x20] sm:$0xff] (!%p139_p2)   ;;  %v1079_v7 = vld [vmem:[%s1248_s1 + $0x28] sm:$0xff] (!%p139_p2)  }
   0x7   : > { %1003 = vmatpush3.bf16.msra.mxu0 (!%p139_p2), %v1074_v0  ;;  %1058 = vmatpush3.bf16.msra.mxu1 (!%p139_p2), %v1074_v0  ;;  %v1080_v8 = vld [vmem:[%s1248_s1 + $0x30] sm:$0xff] (!%p139_p2)   ;;  %v1081_v9 = vld [vmem:[%s1248_s1 + $0x38] sm:$0xff] (!%p139_p2)   ;;  %v1187_v24 = vld [vmem:[%s1249_s2] ss:$0 sm:$0xff] (!%p139_p2) }
   0x8   : > { %1004 = vmatprep.subr.bf16.mxu0 (!%p139_p2), %v1075_v1  ;;  %1051 = vmatprep.subr.bf16.mxu1 (!%p139_p2), %v1075_v1 }
   0xb   : > { %1005 = vmatpush3.bf16.msra.mxu0 (!%p139_p2), %v1075_v1  ;;  %1059 = vmatpush3.bf16.msra.mxu1 (!%p139_p2), %v1075_v1 }
   0xc   : > { %1006 = vmatprep.subr.bf16.mxu0 (!%p139_p2), %v1076_v2  ;;  %1052 = vmatprep.subr.bf16.mxu1 (!%p139_p2), %v1076_v2 }
   0xd   : > { %s1252_s16 = smov (!%p163_p3, %s788_s16), 63 }
   0xe   : > { %s789_s21 = sshll.u32 %s1252_s16, 2 }
   0xf   : > { %s1151_s24 = scalar_lea.vmem %s1247_s0, %s789_s21  ;;  %1007 = vmatpush3.bf16.msra.mxu0 %v1076_v2  ;;  %1060 = vmatpush3.bf16.msra.mxu1 %v1076_v2  ;;  %s1202_s13 = scalar_lea.vmem %s1250_s3, %s789_s21 }
  0x10   : > { %v1082_v4 = vld [vmem:[%s1151_s24] sm:$0xff]   ;;  %1008 = vmatprep.subr.bf16.mxu0 %v1077_v3  ;;  %1053 = vmatprep.subr.bf16.mxu1 %v1077_v3  ;;  %v1084_v10 = vld [vmem:[%s1151_s24 + $0x8] sm:$0xff]   ;;  %v1086_v12 = vld [vmem:[%s1151_s24 + $0x10] sm:$0xff]  }
  0x11   : > { %v1083_v5 = vld [vmem:[%s1151_s24 + $0x40] sm:$0xff]   ;;  %1018 = vmatprep.mubr.bf16.mxu0 %v1082_v4  ;;  %v1085_v11 = vld [vmem:[%s1151_s24 + $0x48] sm:$0xff]   ;;  %v1087_v13 = vld [vmem:[%s1151_s24 + $0x50] sm:$0xff]  }
  0x12   : > { %1034 = vmatprep.mubr.bf16.mxu1 %v1083_v5  ;;  %v1088_v14 = vld [vmem:[%s1151_s24 + $0x18] sm:$0xff]   ;;  %v1090_v16 = vld [vmem:[%s1151_s24 + $0x20] sm:$0xff]   ;;  %v1092_v18 = vld [vmem:[%s1151_s24 + $0x28] sm:$0xff]  }
  0x13   : > { %1009 = vmatpush3.bf16.msra.mxu0 %v1077_v3  ;;  %1061 = vmatpush3.bf16.msra.mxu1 %v1077_v3  ;;  %v1089_v15 = vld [vmem:[%s1151_s24 + $0x58] sm:$0xff]   ;;  %v1091_v17 = vld [vmem:[%s1151_s24 + $0x60] sm:$0xff]   ;;  %v1093_v19 = vld [vmem:[%s1151_s24 + $0x68] sm:$0xff]  }
  0x14   : > { %1010 = vmatprep.subr.bf16.mxu0 %v1078_v6  ;;  %1054 = vmatprep.subr.bf16.mxu1 %v1078_v6  ;;  %v1094_v20 = vld [vmem:[%s1151_s24 + $0x30] sm:$0xff]   ;;  %v1096_v22 = vld [vmem:[%s1151_s24 + $0x38] sm:$0xff]  }
  0x15   : > { %v1095_v21 = vld [vmem:[%s1151_s24 + $0x70] sm:$0xff]   ;;  %v1097_v23 = vld [vmem:[%s1151_s24 + $0x78] sm:$0xff]  }
  0x17   : > { %1011 = vmatpush3.bf16.msra.mxu0 %v1078_v6  ;;  %1062 = vmatpush3.bf16.msra.mxu1 %v1078_v6 }
  0x18   : > { %1012 = vmatprep.subr.bf16.mxu0 %v1079_v7  ;;  %1055 = vmatprep.subr.bf16.mxu1 %v1079_v7 }
  0x1b   : > { %1013 = vmatpush3.bf16.msra.mxu0 %v1079_v7  ;;  %1063 = vmatpush3.bf16.msra.mxu1 %v1079_v7 }
  0x1c   : > { %1014 = vmatprep.subr.bf16.mxu0 %v1080_v8  ;;  %1056 = vmatprep.subr.bf16.mxu1 %v1080_v8 }
  0x1f   : > { %1015 = vmatpush3.bf16.msra.mxu0 %v1080_v8  ;;  %1064 = vmatpush3.bf16.msra.mxu1 %v1080_v8 }
  0x20   : > { %1016 = vmatprep.subr.bf16.mxu0 %v1081_v9  ;;  %1057 = vmatprep.subr.bf16.mxu1 %v1081_v9 }
  0x23   : > { %1017 = vmatpush3.bf16.msra.mxu0 %v1081_v9  ;;  %1065 = vmatpush3.bf16.msra.mxu1 %v1081_v9 }
  0x26   : > { %1019 = vmatmul.mubr.bf16.vlgmr.msra.gmra.mrb[0].mxu0 %v1084_v10  ;;  %1035 = vmatmul.mubr.bf16.vlgmr.msra.gmra.mrb[0].mxu1 %v1085_v11 }
  0x27   : > { %1022 = vmatprep.mubr.bf16.mxu0 %v1086_v12  ;;  %1038 = vmatprep.mubr.bf16.mxu1 %v1087_v13 }
  0x2e   : > { %1023 = vmatmul.mubr.bf16.gmra.mrb[4].mxu0 %v1088_v14  ;;  %1039 = vmatmul.mubr.bf16.gmra.mrb[4].mxu1 %v1089_v15 }
  0x2f   : > { %1026 = vmatprep.mubr.bf16.mxu0 %v1090_v16  ;;  %1042 = vmatprep.mubr.bf16.mxu1 %v1091_v17 }
  0x36   : > { %1027 = vmatmul.mubr.bf16.gmra.mrb[8].mxu0 %v1092_v18  ;;  %1043 = vmatmul.mubr.bf16.gmra.mrb[8].mxu1 %v1093_v19 }
  0x37   : > { %1030 = vmatprep.mubr.bf16.mxu0 %v1094_v20  ;;  %1046 = vmatprep.mubr.bf16.mxu1 %v1095_v21 }
  0x3e   : > { %1031 = vmatmul.mubr.bf16.gmra.mrb[12].mxu0 %v1096_v22  ;;  %1047 = vmatmul.mubr.bf16.gmra.mrb[12].mxu1 %v1097_v23 }
  0xf9   : > { %v1020_v25 = vpop.f32.mrb[0].mxu0  ;;  %v1036_v26 = vpop.f32.mrb[0].mxu1 }
  0xfa   : > { %v417_v27 = vadd.f32 %v1020_v25, %v1187_v24  ;;  %v481_v28 = vadd.f32 %v1036_v26, %v1187_v24  ;;  %v408_v29 = vpop.f32.mrb[1].mxu0  ;;  %v472_v30 = vpop.f32.mrb[1].mxu1 }
  0xfb   : > { %v409_v31 = vadd.f32 %v1187_v24, %v408_v29  ;;  %v473_v32 = vadd.f32 %v1187_v24, %v472_v30  ;;  %v1021_v33 = vpop.f32.mrb[2].mxu0  ;;  %v1037_v34 = vpop.f32.mrb[2].mxu1 }
  0xfc   : > { %v420_v35 = vadd.f32 %v1021_v33, %v1187_v24  ;;  %v484_v36 = vadd.f32 %v1037_v34, %v1187_v24  ;;  %v411_v37 = vpop.f32.mrb[3].mxu0  ;;  %v475_v38 = vpop.f32.mrb[3].mxu1  ;;  %v537_v41 = vmax.f32 %v417_v27, 0.0  ;;  %v553_v42 = vmax.f32 %v481_v28, 0.0 }
  0xfd   : > { %v412_v39 = vadd.f32 %v1187_v24, %v411_v37  ;;  %v476_v40 = vadd.f32 %v1187_v24, %v475_v38  ;;  %v535_v45 = vmax.f32 %v409_v31, 0.0  ;;  %v551_v46 = vmax.f32 %v473_v32, 0.0 }
  0xfe   : > { %v538_v43 = vmax.f32 %v420_v35, 0.0  ;;  %v554_v44 = vmax.f32 %v484_v36, 0.0 }
  0xff   : > { %v536_v47 = vmax.f32 %v412_v39, 0.0  ;;  %v552_v48 = vmax.f32 %v476_v40, 0.0 }
 0x100   : > { %v891_v49 = vpack.c.bf16 %v538_v43, %v537_v41  ;;  %v931_v50 = vpack.c.bf16 %v554_v44, %v553_v42 }
 0x101   : > { %v886_v51 = vpack.c.bf16 %v536_v47, %v535_v45  ;;  %v926_v52 = vpack.c.bf16 %v552_v48, %v551_v46  ;;  %v1024_v53 = vpop.f32.mrb[4].mxu0  ;;  %v1040_v54 = vpop.f32.mrb[4].mxu1 }
 0x102   : > { %963 = vst [vmem:[%s1202_s13 + $0x8] sm:$0xff] %v891_v49   ;;  %971 = vst [vmem:[%s1202_s13 + $0x48] sm:$0xff] %v931_v50   ;;  %v433_v55 = vadd.f32 %v1024_v53, %v1187_v24  ;;  %v497_v56 = vadd.f32 %v1040_v54, %v1187_v24  ;;  %v424_v57 = vpop.f32.mrb[5].mxu0  ;;  %v488_v58 = vpop.f32.mrb[5].mxu1 }
 0x103   : > { %887 = vst [vmem:[%s1202_s13] sm:$0xff] %v886_v51   ;;  %970 = vst [vmem:[%s1202_s13 + $0x40] sm:$0xff] %v926_v52   ;;  %v425_v59 = vadd.f32 %v1187_v24, %v424_v57  ;;  %v489_v60 = vadd.f32 %v1187_v24, %v488_v58  ;;  %v1025_v61 = vpop.f32.mrb[6].mxu0  ;;  %v1041_v62 = vpop.f32.mrb[6].mxu1 }
 0x104   : > { %v436_v63 = vadd.f32 %v1025_v61, %v1187_v24  ;;  %v500_v0 = vadd.f32 %v1041_v62, %v1187_v24  ;;  %v427_v1 = vpop.f32.mrb[7].mxu0  ;;  %v491_v2 = vpop.f32.mrb[7].mxu1  ;;  %v541_v5 = vmax.f32 %v433_v55, 0.0  ;;  %v557_v6 = vmax.f32 %v497_v56, 0.0 }
 0x105   : > { %v428_v3 = vadd.f32 %v1187_v24, %v427_v1  ;;  %v492_v4 = vadd.f32 %v1187_v24, %v491_v2  ;;  %v539_v9 = vmax.f32 %v425_v59, 0.0  ;;  %v555_v10 = vmax.f32 %v489_v60, 0.0 }
 0x106   : > { %v542_v7 = vmax.f32 %v436_v63, 0.0  ;;  %v558_v8 = vmax.f32 %v500_v0, 0.0 }
 0x107   : > { %v540_v11 = vmax.f32 %v428_v3, 0.0  ;;  %v556_v12 = vmax.f32 %v492_v4, 0.0 }
 0x108   : > { %v901_v13 = vpack.c.bf16 %v542_v7, %v541_v5  ;;  %v941_v14 = vpack.c.bf16 %v558_v8, %v557_v6 }
 0x109   : > { %v896_v15 = vpack.c.bf16 %v540_v11, %v539_v9  ;;  %v936_v16 = vpack.c.bf16 %v556_v12, %v555_v10  ;;  %v1028_v17 = vpop.f32.mrb[8].mxu0  ;;  %v1044_v18 = vpop.f32.mrb[8].mxu1 }
 0x10a   : > { %965 = vst [vmem:[%s1202_s13 + $0x18] sm:$0xff] %v901_v13   ;;  %973 = vst [vmem:[%s1202_s13 + $0x58] sm:$0xff] %v941_v14   ;;  %v449_v19 = vadd.f32 %v1028_v17, %v1187_v24  ;;  %v513_v20 = vadd.f32 %v1044_v18, %v1187_v24  ;;  %v440_v21 = vpop.f32.mrb[9].mxu0  ;;  %v504_v22 = vpop.f32.mrb[9].mxu1 }
 0x10b   : > { %964 = vst [vmem:[%s1202_s13 + $0x10] sm:$0xff] %v896_v15   ;;  %972 = vst [vmem:[%s1202_s13 + $0x50] sm:$0xff] %v936_v16   ;;  %v441_v23 = vadd.f32 %v1187_v24, %v440_v21  ;;  %v505_v25 = vadd.f32 %v1187_v24, %v504_v22  ;;  %v1029_v26 = vpop.f32.mrb[10].mxu0  ;;  %v1045_v27 = vpop.f32.mrb[10].mxu1 }
 0x10c   : > { %v452_v28 = vadd.f32 %v1029_v26, %v1187_v24  ;;  %v516_v29 = vadd.f32 %v1045_v27, %v1187_v24  ;;  %v443_v30 = vpop.f32.mrb[11].mxu0  ;;  %v507_v31 = vpop.f32.mrb[11].mxu1  ;;  %v545_v34 = vmax.f32 %v449_v19, 0.0  ;;  %v561_v35 = vmax.f32 %v513_v20, 0.0 }
 0x10d   : > { %v444_v32 = vadd.f32 %v1187_v24, %v443_v30  ;;  %v508_v33 = vadd.f32 %v1187_v24, %v507_v31  ;;  %v543_v38 = vmax.f32 %v441_v23, 0.0  ;;  %v559_v39 = vmax.f32 %v505_v25, 0.0 }
 0x10e   : > { %v546_v36 = vmax.f32 %v452_v28, 0.0  ;;  %v562_v37 = vmax.f32 %v516_v29, 0.0 }
 0x10f   : > { %v544_v40 = vmax.f32 %v444_v32, 0.0  ;;  %v560_v41 = vmax.f32 %v508_v33, 0.0 }
 0x110   : > { %v911_v42 = vpack.c.bf16 %v546_v36, %v545_v34  ;;  %v951_v43 = vpack.c.bf16 %v562_v37, %v561_v35 }
 0x111   : > { %v906_v44 = vpack.c.bf16 %v544_v40, %v543_v38  ;;  %v946_v45 = vpack.c.bf16 %v560_v41, %v559_v39  ;;  %v1032_v46 = vpop.f32.mrb[12].mxu0  ;;  %v1048_v47 = vpop.f32.mrb[12].mxu1 }
 0x112   : > { %967 = vst [vmem:[%s1202_s13 + $0x28] sm:$0xff] %v911_v42   ;;  %975 = vst [vmem:[%s1202_s13 + $0x68] sm:$0xff] %v951_v43   ;;  %v465_v48 = vadd.f32 %v1032_v46, %v1187_v24  ;;  %v529_v49 = vadd.f32 %v1048_v47, %v1187_v24  ;;  %v456_v50 = vpop.f32.mrb[13].mxu0  ;;  %v520_v51 = vpop.f32.mrb[13].mxu1 }
 0x113   : > { %966 = vst [vmem:[%s1202_s13 + $0x20] sm:$0xff] %v906_v44   ;;  %974 = vst [vmem:[%s1202_s13 + $0x60] sm:$0xff] %v946_v45   ;;  %v457_v52 = vadd.f32 %v1187_v24, %v456_v50  ;;  %v521_v53 = vadd.f32 %v1187_v24, %v520_v51  ;;  %v1033_v54 = vpop.f32.mrb[14].mxu0  ;;  %v1049_v55 = vpop.f32.mrb[14].mxu1 }
 0x114   : > { %v468_v56 = vadd.f32 %v1033_v54, %v1187_v24  ;;  %v532_v57 = vadd.f32 %v1049_v55, %v1187_v24  ;;  %v459_v58 = vpop.f32.mrb[15].mxu0  ;;  %v523_v59 = vpop.f32.mrb[15].mxu1  ;;  %v549_v62 = vmax.f32 %v465_v48, 0.0  ;;  %v565_v63 = vmax.f32 %v529_v49, 0.0 }
 0x115   : > { %v460_v60 = vadd.f32 %v1187_v24, %v459_v58  ;;  %v524_v61 = vadd.f32 %v1187_v24, %v523_v59  ;;  %v547_v2 = vmax.f32 %v457_v52, 0.0  ;;  %v563_v3 = vmax.f32 %v521_v53, 0.0 }
 0x116   : > { %v550_v0 = vmax.f32 %v468_v56, 0.0  ;;  %v566_v1 = vmax.f32 %v532_v57, 0.0 }
 0x117   : > { %v548_v4 = vmax.f32 %v460_v60, 0.0  ;;  %v564_v5 = vmax.f32 %v524_v61, 0.0 }
 0x118   : > { %v921_v6 = vpack.c.bf16 %v550_v0, %v549_v62  ;;  %v961_v7 = vpack.c.bf16 %v566_v1, %v565_v63 }
 0x119   : > { %v916_v8 = vpack.c.bf16 %v548_v4, %v547_v2  ;;  %v956_v9 = vpack.c.bf16 %v564_v5, %v563_v3 }
 0x11a   : > { %969 = vst [vmem:[%s1202_s13 + $0x38] sm:$0xff] %v921_v6   ;;  %977 = vst [vmem:[%s1202_s13 + $0x78] sm:$0xff] %v961_v7  }
 0x11b   : > { %968 = vst [vmem:[%s1202_s13 + $0x30] sm:$0xff] %v916_v8   ;;  %976 = vst [vmem:[%s1202_s13 + $0x70] sm:$0xff] %v956_v9  }
 0x11c PF: > { %s13_s12 = sadd.s32 1, %s1104_s12  }
 0x11d   : > { %p10_p4 = scmp.ge.s32.totalorder %s13_s12, 4  }
 0x11f   :  { %12 = sbr.rel (!%p10_p4) target bundleno = 1 (0x1), region = 62 }

// kernel: discriminator_forward.7
= control target key start
LH: loop header
LB: loop body
LE: loop exit
PB: predicated region body
PF: predicated region fallthrough
CT: control target
= control target key end

     0   :  { %s1258_s21 = smov 0   ;;  %s1460_s0 = inlined_call_operand.vmem [shape: bf16[128,128], index: 0, kind: input, shape index: {}]   ;;  %s1461_s1 = inlined_call_operand.vmem [shape: bf16[128,128], index: 1, kind: input, shape index: {}]   ;;  %s1462_s2 = inlined_call_operand.vmem [shape: f32[1,128], index: 2, kind: input, shape index: {}]   ;;  %s1463_s3 = inlined_call_operand.vmem [shape: bf16[128,128], index: 3, kind: input, shape index: {}]   ;;  %s1464_s4 = inlined_call_operand.vmem [shape: bf16[128,512], index: 4, kind: input, shape index: {}]   ;;  %s1465_s5 = inlined_call_operand.vmem [shape: f32[1,128], index: 5, kind: input, shape index: {}]   ;;  %s1466_s6 = inlined_call_operand.vmem [shape: bf16[128,128], index: 6, kind: output, shape index: {}]  }
   0x1 LB: > { %s987_s22 = sadd.s32 4294967295, %s1220_s21   ;;  %p991_p0 = scmp.ge.s32.totalorder %s1220_s21, 1  ;;  %s1220_s21 = sphi %s1258_s21, %s16_s21  }
   0x2   : > { %p224_p1 = scmp.lt.s32.totalorder %s1220_s21, 3 }
   0x4   : > { %p225_p2 = pnand %p991_p0, %p224_p1 }
   0x5   : > { %v1150_v0 = vld [vmem:[%s1461_s1] sm:$0xff] (!%p225_p2)   ;;  %s992_s25 = sshll.u32 (!%p225_p2), %s987_s22, 3  ;;  %v1222_v3 = vmov (!%p225_p2), 0   ;;  %v1154_v4 = vld [vmem:[%s1461_s1 + $0x8] sm:$0xff] (!%p225_p2)   ;;  %v1158_v7 = vld [vmem:[%s1461_s1 + $0x10] sm:$0xff] (!%p225_p2)  }
   0x6   : > { %228 = sbr.rel (%p225_p2) target bundleno = 304 (0x130), region = 44  ;;  %v1151_v1 = vld [vmem:[%s1464_s4 + $0x4] ss:$16 sps:$4 sm:$0xff] (!%p225_p2)   ;;  %1101 = vmatprep.subr.bf16.mxu0 (!%p225_p2), %v1150_v0  ;;  %v1153_v2 = vld [vmem:[%s1464_s4] ss:$16 sps:$4 sm:$0xff] (!%p225_p2)   ;;  %718 = vmatprep.mubr.bf16.mxu1 (!%p225_p2), %v1222_v3  ;;  %p260_p3 = scmp.lt.s32.totalorder (!%p225_p2), %s992_s25, 15 }
   0x7   : > { %686 = vmatprep.subr.bf16.mxu1 (!%p225_p2), %v1151_v1  ;;  %1102 = vmatpush3.bf16.msra.mxu0 (!%p225_p2), %v1150_v0  ;;  %v1155_v5 = vld [vmem:[%s1464_s4 + $0x24] ss:$16 sps:$4 sm:$0xff] (!%p225_p2)   ;;  %v1157_v6 = vld [vmem:[%s1464_s4 + $0x20] ss:$16 sps:$4 sm:$0xff] (!%p225_p2)   ;;  %v1162_v10 = vld [vmem:[%s1461_s1 + $0x18] sm:$0xff] (!%p225_p2)  }
   0x8   : > { %687 = vmatpush1.bf16.msra.mxu1 (!%p225_p2), %v1153_v2  ;;  %1103 = vmatprep.subr.bf16.mxu0 (!%p225_p2), %v1154_v4  ;;  %v1159_v8 = vld [vmem:[%s1464_s4 + $0x44] ss:$16 sps:$4 sm:$0xff] (!%p225_p2)   ;;  %v1161_v9 = vld [vmem:[%s1464_s4 + $0x40] ss:$16 sps:$4 sm:$0xff] (!%p225_p2)   ;;  %v1170_v16 = vld [vmem:[%s1461_s1 + $0x28] sm:$0xff] (!%p225_p2)  }
   0x9   : > { %688 = vmatprep.subr.bf16.mxu1 (!%p225_p2), %v1155_v5  ;;  %v1163_v11 = vld [vmem:[%s1464_s4 + $0x64] ss:$16 sps:$4 sm:$0xff] (!%p225_p2)   ;;  %v1165_v12 = vld [vmem:[%s1464_s4 + $0x60] ss:$16 sps:$4 sm:$0xff] (!%p225_p2)   ;;  %v1178_v23 = vld [vmem:[%s1461_s1 + $0x38] sm:$0xff] (!%p225_p2)  }
   0xa   : > { %v1166_v13 = vld [vmem:[%s1461_s1 + $0x20] sm:$0xff] (!%p225_p2)   ;;  %v1174_v20 = vld [vmem:[%s1461_s1 + $0x30] sm:$0xff] (!%p225_p2)   ;;  %v1187_v26 = vld [vmem:[%s1464_s4 + $0xc] ss:$16 sps:$4 sm:$0xff] (!%p225_p2)  }
   0xb   : > { %1104 = vmatpush3.bf16.msra.mxu0 (!%p225_p2), %v1154_v4  ;;  %v1167_v14 = vld [vmem:[%s1464_s4 + $0x84] ss:$16 sps:$4 sm:$0xff] (!%p225_p2)   ;;  %v1169_v15 = vld [vmem:[%s1464_s4 + $0x80] ss:$16 sps:$4 sm:$0xff] (!%p225_p2)   ;;  %v1185_v29 = vld [vmem:[%s1464_s4 + $0x8] ss:$16 sps:$4 sm:$0xff] (!%p225_p2)  }
   0xc   : > { %689 = vmatpush1.bf16.msra.mxu1 (!%p225_p2), %v1157_v6  ;;  %1105 = vmatprep.subr.bf16.mxu0 (!%p225_p2), %v1158_v7  ;;  %v1171_v17 = vld [vmem:[%s1464_s4 + $0xa4] ss:$16 sps:$4 sm:$0xff] (!%p225_p2)   ;;  %v1173_v18 = vld [vmem:[%s1464_s4 + $0xa0] ss:$16 sps:$4 sm:$0xff] (!%p225_p2)   ;;  %v1190_v30 = vld [vmem:[%s1464_s4 + $0x2c] ss:$16 sps:$4 sm:$0xff] (!%p225_p2)  }
   0xd   : > { %s1468_s25 = smov (!%p260_p3, %s992_s25), 15  ;;  %690 = vmatprep.subr.bf16.mxu1 %v1159_v8  ;;  %v1175_v21 = vld [vmem:[%s1464_s4 + $0xc4] ss:$16 sps:$4 sm:$0xff]   ;;  %v1177_v22 = vld [vmem:[%s1464_s4 + $0xc0] ss:$16 sps:$4 sm:$0xff]  }
   0xe   : > { %s1309_s30 = sshll.u32 %s1468_s25, 2  ;;  %v1179_v24 = vld [vmem:[%s1464_s4 + $0xe4] ss:$16 sps:$4 sm:$0xff]   ;;  %v1181_v25 = vld [vmem:[%s1464_s4 + $0xe0] ss:$16 sps:$4 sm:$0xff]  }
   0xf   : > { %1106 = vmatpush3.bf16.msra.mxu0 %v1158_v7  ;;  %s1321_s13 = scalar_lea.vmem %s1460_s0, %s1309_s30  ;;  %s1334_s19 = scalar_lea.vmem %s1463_s3, %s1309_s30  ;;  %v1188_v32 = vld [vmem:[%s1464_s4 + $0x28] ss:$16 sps:$4 sm:$0xff]   ;;  %v1194_v33 = vld [vmem:[%s1464_s4 + $0x4c] ss:$16 sps:$4 sm:$0xff]  }
  0x10   : > { %691 = vmatpush1.bf16.msra.mxu1 %v1161_v9  ;;  %1107 = vmatprep.subr.bf16.mxu0 %v1162_v10  ;;  %v1182_v19 = vld [vmem:[%s1321_s13] sm:$0xff]   ;;  %v1183_v27 = vld [vmem:[%s1321_s13 + $0x8] sm:$0xff]   ;;  %v1202_v31 = vld [vmem:[%s1321_s13 + $0x10] sm:$0xff]  }
  0x11   : > { %692 = vmatprep.subr.bf16.mxu1 %v1163_v11  ;;  %1117 = vmatprep.mubr.bf16.mxu0 %v1182_v19  ;;  %v1359_v28 = vld [vmem:[%s1334_s19] sm:$0xff]   ;;  %v1203_v34 = vld [vmem:[%s1321_s13 + $0x18] sm:$0xff]   ;;  %v1191_v35 = vld [vmem:[%s1334_s19 + $0x8] sm:$0xff]   ;;  %s1448_s13 = scalar_lea.vmem %s1466_s6, %s1309_s30 }
  0x12   : > { %v1192_v36 = vld [vmem:[%s1464_s4 + $0x48] ss:$16 sps:$4 sm:$0xff]   ;;  %v1197_v37 = vld [vmem:[%s1464_s4 + $0x6c] ss:$16 sps:$4 sm:$0xff]   ;;  %v1198_v40 = vld [vmem:[%s1334_s19 + $0x10] sm:$0xff]  }
  0x13   : > { %1108 = vmatpush3.bf16.msra.mxu0 %v1162_v10  ;;  %v1195_v38 = vld [vmem:[%s1464_s4 + $0x68] ss:$16 sps:$4 sm:$0xff]   ;;  %v1201_v39 = vld [vmem:[%s1464_s4 + $0x8c] ss:$16 sps:$4 sm:$0xff]   ;;  %v998_v11 = vld [vmem:[%s1462_s2] ss:$0 sm:$0xff] }
  0x14   : > { %693 = vmatpush1.bf16.msra.mxu1 %v1165_v12  ;;  %1109 = vmatprep.subr.bf16.mxu0 %v1166_v13  ;;  %v1199_v41 = vld [vmem:[%s1464_s4 + $0x88] ss:$16 sps:$4 sm:$0xff]   ;;  %v1206_v42 = vld [vmem:[%s1464_s4 + $0xac] ss:$16 sps:$4 sm:$0xff]  }
  0x15   : > { %694 = vmatprep.subr.bf16.mxu1 %v1167_v14  ;;  %v1204_v43 = vld [vmem:[%s1464_s4 + $0xa8] ss:$16 sps:$4 sm:$0xff]   ;;  %v1210_v44 = vld [vmem:[%s1464_s4 + $0xcc] ss:$16 sps:$4 sm:$0xff]  }
  0x16   : > { %v1207_v45 = vld [vmem:[%s1334_s19 + $0x18] sm:$0xff]  }
  0x17   : > { %1110 = vmatpush3.bf16.msra.mxu0 %v1166_v13  ;;  %v1208_v46 = vld [vmem:[%s1464_s4 + $0xc8] ss:$16 sps:$4 sm:$0xff]   ;;  %v1213_v47 = vld [vmem:[%s1464_s4 + $0xec] ss:$16 sps:$4 sm:$0xff]  }
  0x18   : > { %695 = vmatpush1.bf16.msra.mxu1 %v1169_v15  ;;  %1111 = vmatprep.subr.bf16.mxu0 %v1170_v16  ;;  %v1211_v48 = vld [vmem:[%s1464_s4 + $0xe8] ss:$16 sps:$4 sm:$0xff]  }
  0x19   : > { %696 = vmatprep.subr.bf16.mxu1 %v1171_v17 }
  0x1b   : > { %1112 = vmatpush3.bf16.msra.mxu0 %v1170_v16 }
  0x1c   : > { %697 = vmatpush1.bf16.msra.mxu1 %v1173_v18  ;;  %1113 = vmatprep.subr.bf16.mxu0 %v1174_v20 }
  0x1d   : > { %698 = vmatprep.subr.bf16.mxu1 %v1175_v21 }
  0x1f   : > { %1114 = vmatpush3.bf16.msra.mxu0 %v1174_v20 }
  0x20   : > { %699 = vmatpush1.bf16.msra.mxu1 %v1177_v22  ;;  %1115 = vmatprep.subr.bf16.mxu0 %v1178_v23 }
  0x21   : > { %700 = vmatprep.subr.bf16.mxu1 %v1179_v24 }
  0x23   : > { %1116 = vmatpush3.bf16.msra.mxu0 %v1178_v23 }
  0x24   : > { %701 = vmatpush1.bf16.msra.mxu1 %v1181_v25  ;;  %759 = vmatprep.subr.bf16.mxu0 %v1187_v26 }
  0x25   : > { %1125 = vmatprep.subr.bf16.mxu1 %v1187_v26 }
  0x26   : > { %1118 = vmatmul.mubr.bf16.vlgmr.msra.gmra.mrb[0].mxu0 %v1183_v27 }
  0x27   : > { %719 = vmatmul.mubr.bf16.vlgmr.msra.gmra.mrb[0].mxu1 %v1359_v28  ;;  %760 = vmatpush1.bf16.msra.mxu0 %v1185_v29 }
  0x28   : > { %1133 = vmatpush1.bf16.msra.mxu1 %v1185_v29  ;;  %761 = vmatprep.subr.bf16.mxu0 %v1190_v30 }
  0x29   : > { %1126 = vmatprep.subr.bf16.mxu1 %v1190_v30  ;;  %728 = vmatprep.mubr.bf16.mxu1 %v1222_v3 }
  0x2a   : > { %1121 = vmatprep.mubr.bf16.mxu0 %v1202_v31 }
  0x2b   : > { %762 = vmatpush1.bf16.msra.mxu0 %v1188_v32 }
  0x2c   : > { %1134 = vmatpush1.bf16.msra.mxu1 %v1188_v32  ;;  %763 = vmatprep.subr.bf16.mxu0 %v1194_v33 }
  0x2d   : > { %1127 = vmatprep.subr.bf16.mxu1 %v1194_v33 }
  0x2e   : > { %1122 = vmatmul.mubr.bf16.gmra.mrb[4].mxu0 %v1203_v34 }
  0x2f   : > { %729 = vmatmul.mubr.bf16.gmra.mrb[4].mxu1 %v1191_v35  ;;  %764 = vmatpush1.bf16.msra.mxu0 %v1192_v36 }
  0x30   : > { %1135 = vmatpush1.bf16.msra.mxu1 %v1192_v36  ;;  %765 = vmatprep.subr.bf16.mxu0 %v1197_v37 }
  0x31   : > { %1128 = vmatprep.subr.bf16.mxu1 %v1197_v37  ;;  %738 = vmatprep.mubr.bf16.mxu1 %v1222_v3 }
  0x32   : > { %791 = vmatprep.mubr.bf16.mxu0 %v1222_v3 }
  0x33   : > { %766 = vmatpush1.bf16.msra.mxu0 %v1195_v38 }
  0x34   : > { %1136 = vmatpush1.bf16.msra.mxu1 %v1195_v38  ;;  %767 = vmatprep.subr.bf16.mxu0 %v1201_v39 }
  0x35   : > { %1129 = vmatprep.subr.bf16.mxu1 %v1201_v39 }
  0x37   : > { %739 = vmatmul.mubr.bf16.gmra.mrb[8].mxu1 %v1198_v40  ;;  %768 = vmatpush1.bf16.msra.mxu0 %v1199_v41 }
  0x38   : > { %1137 = vmatpush1.bf16.msra.mxu1 %v1199_v41  ;;  %769 = vmatprep.subr.bf16.mxu0 %v1206_v42 }
  0x39   : > { %1130 = vmatprep.subr.bf16.mxu1 %v1206_v42  ;;  %748 = vmatprep.mubr.bf16.mxu1 %v1222_v3 }
  0x3b   : > { %770 = vmatpush1.bf16.msra.mxu0 %v1204_v43 }
  0x3c   : > { %1138 = vmatpush1.bf16.msra.mxu1 %v1204_v43  ;;  %771 = vmatprep.subr.bf16.mxu0 %v1210_v44 }
  0x3d   : > { %1131 = vmatprep.subr.bf16.mxu1 %v1210_v44 }
  0x3f   : > { %749 = vmatmul.mubr.bf16.gmra.mrb[12].mxu1 %v1207_v45  ;;  %772 = vmatpush1.bf16.msra.mxu0 %v1208_v46 }
  0x40   : > { %1139 = vmatpush1.bf16.msra.mxu1 %v1208_v46  ;;  %773 = vmatprep.subr.bf16.mxu0 %v1213_v47 }
  0x41   : > { %1132 = vmatprep.subr.bf16.mxu1 %v1213_v47  ;;  %811 = vmatprep.mubr.bf16.mxu1 %v1222_v3 }
  0x43   : > { %774 = vmatpush1.bf16.msra.mxu0 %v1211_v48 }
  0x44   : > { %1140 = vmatpush1.bf16.msra.mxu1 %v1211_v48 }
  0x46   : > { %792 = vmatmul.mubr.bf16.vlgmr.msra.gmra.mrb[8].mxu0 %v1359_v28 }
  0x47   : > { %812 = vmatmul.mubr.bf16.vlgmr.msra.gmra.mrb[16].mxu1 %v1198_v40  ;;  %801 = vmatprep.mubr.bf16.mxu0 %v1222_v3 }
  0x48   : > { %821 = vmatprep.mubr.bf16.mxu1 %v1222_v3 }
  0x4e   : > { %802 = vmatmul.mubr.bf16.gmra.mrb[12].mxu0 %v1191_v35 }
  0x4f   : > { %822 = vmatmul.mubr.bf16.gmra.mrb[20].mxu1 %v1207_v45 }
  0xf9   : > { %v1119_v49 = vpop.f32.mrb[0].mxu0 }
  0xfa   : > { %v720_v50 = vpop.f32.mrb[0].mxu1  ;;  %v415_v51 = vpop.f32.mrb[1].mxu0  ;;  %v424_v33 = vadd.f32 %v1119_v49, %v998_v11  ;;  %v1047_v49 = vld [vmem:[%s1465_s5] ss:$0 sm:$0xff] }
  0xfb   : > { %v722_v52 = vpop.f32.mrb[1].mxu1  ;;  %v1120_v53 = vpop.f32.mrb[2].mxu0  ;;  %v416_v14 = vadd.f32 %v998_v11, %v415_v51 }
  0xfc   : > { %v832_v54 = vmax.f32 %v720_v50, %v722_v52  ;;  %v724_v55 = vpop.f32.mrb[2].mxu1  ;;  %v418_v56 = vpop.f32.mrb[3].mxu0  ;;  %v427_v44 = vadd.f32 %v1120_v53, %v998_v11 }
  0xfd   : > { %v726_v57 = vpop.f32.mrb[3].mxu1  ;;  %v419_v19 = vadd.f32 %v998_v11, %v418_v56  ;;  %v446_v22 = vmul.f32 0.2, %v416_v14 }
  0xfe   : > { %v833_v58 = vmax.f32 %v724_v55, %v726_v57 }
  0xff   : > { %v447_v25 = vmul.f32 0.2, %v419_v19  ;;  %v454_v34 = vmax.f32 %v416_v14, %v446_v22 }
 0x101   : > { %v1123_v59 = vpop.f32.mrb[4].mxu0  ;;  %v455_v45 = vmax.f32 %v419_v19, %v447_v25 }
 0x102   : > { %v1420_v60 = vpop.f32.mrb[4].mxu1  ;;  %v431_v61 = vpop.f32.mrb[5].mxu0  ;;  %v440_v39 = vadd.f32 %v1123_v59, %v998_v11  ;;  %v449_v59 = vmul.f32 0.2, %v427_v44 }
 0x103   : > { %v1422_v62 = vpop.f32.mrb[5].mxu1  ;;  %v1124_v63 = vpop.f32.mrb[6].mxu0  ;;  %v432_v17 = vadd.f32 %v998_v11, %v431_v61 }
 0x104   : > { %v834_v0 = vmax.f32 %v1420_v60, %v1422_v62  ;;  %v1426_v1 = vpop.f32.mrb[6].mxu1  ;;  %v434_v2 = vpop.f32.mrb[7].mxu0  ;;  %v443_v48 = vadd.f32 %v1124_v63, %v998_v11  ;;  %v452_v56 = vmul.f32 0.2, %v440_v39  ;;  %v457_v22 = vmax.f32 %v427_v44, %v449_v59 }
 0x105   : > { %v1428_v3 = vpop.f32.mrb[7].mxu1  ;;  %v435_v21 = vadd.f32 %v998_v11, %v434_v2  ;;  %v450_v23 = vmul.f32 0.2, %v432_v17 }
 0x106   : > { %v835_v4 = vmax.f32 %v1426_v1, %v1428_v3  ;;  %v453_v63 = vmul.f32 0.2, %v443_v48 }
 0x107   : > { %v451_v29 = vmul.f32 0.2, %v435_v21  ;;  %v458_v40 = vmax.f32 %v432_v17, %v450_v23 }
 0x109   : > { %v459_v50 = vmax.f32 %v435_v21, %v451_v29 }
 0x10a   : > { %v740_v5 = vpop.f32.mrb[8].mxu1 }
 0x10b   : > { %v742_v6 = vpop.f32.mrb[9].mxu1 }
 0x10c   : > { %v836_v7 = vmax.f32 %v740_v5, %v742_v6  ;;  %v744_v8 = vpop.f32.mrb[10].mxu1 }
 0x10d   : > { %v746_v9 = vpop.f32.mrb[11].mxu1 }
 0x10e   : > { %v837_v10 = vmax.f32 %v744_v8, %v746_v9 }
 0x112   : > { %v750_v12 = vpop.f32.mrb[12].mxu1 }
 0x113   : > { %v752_v13 = vpop.f32.mrb[13].mxu1 }
 0x114   : > { %v838_v15 = vmax.f32 %v750_v12, %v752_v13  ;;  %v1435_v16 = vpop.f32.mrb[14].mxu1 }
 0x115   : > { %v1437_v18 = vpop.f32.mrb[15].mxu1 }
 0x116   : > { %v839_v20 = vmax.f32 %v1435_v16, %v1437_v18  ;;  %v460_v16 = vmax.f32 %v440_v39, %v452_v56 }
 0x119   : > { %v793_v24 = vpop.f32.mrb[8].mxu0 }
 0x11a   : > { %v840_v26 = vmax.f32 %v832_v54, %v793_v24  ;;  %v813_v27 = vpop.f32.mrb[16].mxu1  ;;  %v795_v28 = vpop.f32.mrb[9].mxu0  ;;  %v448_v54 = vmul.f32 0.2, %v424_v33  ;;  %v461_v24 = vmax.f32 %v443_v48, %v453_v63 }
 0x11b   : > { %v844_v30 = vmax.f32 %v836_v7, %v813_v27  ;;  %v815_v31 = vpop.f32.mrb[17].mxu1  ;;  %v797_v32 = vpop.f32.mrb[10].mxu0 }
 0x11c   : > { %v848_v35 = vmax.f32 %v840_v26, %v795_v28  ;;  %v841_v36 = vmax.f32 %v833_v58, %v797_v32  ;;  %v817_v37 = vpop.f32.mrb[18].mxu1  ;;  %v799_v38 = vpop.f32.mrb[11].mxu0 }
 0x11d   : > { %v852_v41 = vmax.f32 %v844_v30, %v815_v31  ;;  %v845_v42 = vmax.f32 %v837_v10, %v817_v37  ;;  %v819_v43 = vpop.f32.mrb[19].mxu1  ;;  %v456_v10 = vmax.f32 %v424_v33, %v448_v54 }
 0x11e   : > { %v856_v46 = vadd.f32 %v848_v35, %v454_v34  ;;  %v849_v47 = vmax.f32 %v841_v36, %v799_v38 }
 0x11f   : > { %v860_v51 = vadd.f32 %v852_v41, %v458_v40  ;;  %v853_v52 = vmax.f32 %v845_v42, %v819_v43 }
 0x120   : > { %v857_v55 = vadd.f32 %v849_v47, %v455_v45  ;;  %v871_v60 = vadd.f32 %v1047_v49, %v856_v46 }
 0x121   : > { %v861_v57 = vadd.f32 %v853_v52, %v459_v50  ;;  %v803_v58 = vpop.f32.mrb[12].mxu0  ;;  %v875_v5 = vadd.f32 %v1047_v49, %v860_v51 }
 0x122   : > { %v872_v53 = vadd.f32 %v1047_v49, %v857_v55  ;;  %v842_v61 = vmax.f32 %v834_v0, %v803_v58  ;;  %v823_v62 = vpop.f32.mrb[20].mxu1  ;;  %v805_v2 = vpop.f32.mrb[13].mxu0 }
 0x123   : > { %v876_v6 = vadd.f32 %v1047_v49, %v861_v57  ;;  %v846_v7 = vmax.f32 %v838_v15, %v823_v62  ;;  %v825_v8 = vpop.f32.mrb[21].mxu1  ;;  %v807_v9 = vpop.f32.mrb[14].mxu0 }
 0x124   : > { %v1069_v11 = vpack.c.bf16 %v872_v53, %v871_v60  ;;  %v850_v12 = vmax.f32 %v842_v61, %v805_v2  ;;  %v843_v0 = vmax.f32 %v835_v4, %v807_v9  ;;  %v827_v13 = vpop.f32.mrb[22].mxu1  ;;  %v809_v14 = vpop.f32.mrb[15].mxu0 }
 0x125   : > { %v1079_v17 = vpack.c.bf16 %v876_v6, %v875_v5  ;;  %v854_v18 = vmax.f32 %v846_v7, %v825_v8  ;;  %v847_v19 = vmax.f32 %v839_v20, %v827_v13  ;;  %v829_v21 = vpop.f32.mrb[23].mxu1 }
 0x126   : > { %1070 = vst [vmem:[%s1448_s13] sm:$0xff] %v1069_v11   ;;  %v858_v15 = vadd.f32 %v850_v12, %v456_v10  ;;  %v851_v23 = vmax.f32 %v843_v0, %v809_v14 }
 0x127   : > { %1087 = vst [vmem:[%s1448_s13 + $0x10] sm:$0xff] %v1079_v17   ;;  %v862_v25 = vadd.f32 %v854_v18, %v460_v16  ;;  %v855_v26 = vmax.f32 %v847_v19, %v829_v21 }
 0x128   : > { %v859_v27 = vadd.f32 %v851_v23, %v457_v22  ;;  %v873_v3 = vadd.f32 %v1047_v49, %v858_v15 }
 0x129   : > { %v863_v1 = vadd.f32 %v855_v26, %v461_v24  ;;  %v877_v28 = vadd.f32 %v1047_v49, %v862_v25 }
 0x12a   : > { %v874_v4 = vadd.f32 %v1047_v49, %v859_v27 }
 0x12b   : > { %v878_v29 = vadd.f32 %v1047_v49, %v863_v1 }
 0x12c   : > { %v1074_v30 = vpack.c.bf16 %v874_v4, %v873_v3 }
 0x12d   : > { %v1084_v31 = vpack.c.bf16 %v878_v29, %v877_v28 }
 0x12e   : > { %1086 = vst [vmem:[%s1448_s13 + $0x8] sm:$0xff] %v1074_v30  }
 0x12f   : > { %1088 = vst [vmem:[%s1448_s13 + $0x18] sm:$0xff] %v1084_v31  }
 0x130 PF: > { %s16_s21 = sadd.s32 1, %s1220_s21  }
 0x131   : > { %p13_p4 = scmp.ge.s32.totalorder %s16_s21, 4  }
 0x133   :  { %15 = sbr.rel (!%p13_p4) target bundleno = 1 (0x1), region = 77 }

// kernel: discriminator_forward.8
= control target key start
LH: loop header
LB: loop body
LE: loop exit
PB: predicated region body
PF: predicated region fallthrough
CT: control target
= control target key end

     0   :  { %s610_s12 = smov 0   ;;  %s667_s0 = inlined_call_operand.vmem [shape: bf16[128,128], index: 0, kind: input, shape index: {}]   ;;  %s668_s1 = inlined_call_operand.vmem [shape: bf16[128,128], index: 1, kind: input, shape index: {}]   ;;  %s669_s2 = inlined_call_operand.vmem [shape: f32[1,128], index: 2, kind: input, shape index: {}]   ;;  %s670_s3 = inlined_call_operand.vmem [shape: bf16[128,128], index: 3, kind: output, shape index: {}]  }
   0x1 LB: > { %s447_s13 = sadd.s32 4294967295, %s588_s12   ;;  %p451_p0 = scmp.ge.s32.totalorder %s588_s12, 1  ;;  %s588_s12 = sphi %s610_s12, %s13_s12  }
   0x2   : > { %p138_p1 = scmp.lt.s32.totalorder %s588_s12, 3 }
   0x4   : > { %p139_p2 = pnand %p451_p0, %p138_p1 }
   0x5   : > { %v570_v0 = vld [vmem:[%s668_s1] sm:$0xff] (!%p139_p2)   ;;  %s452_s16 = sshll.u32 (!%p139_p2), %s447_s13, 3  ;;  %v571_v1 = vld [vmem:[%s668_s1 + $0x8] sm:$0xff] (!%p139_p2)   ;;  %v572_v2 = vld [vmem:[%s668_s1 + $0x10] sm:$0xff] (!%p139_p2)  }
   0x6   : > { %142 = sbr.rel (%p139_p2) target bundleno = 260 (0x104), region = 32  ;;  %p163_p3 = scmp.lt.s32.totalorder (!%p139_p2), %s452_s16, 15  ;;  %522 = vmatprep.subr.bf16.mxu0 (!%p139_p2), %v570_v0  ;;  %546 = vmatprep.subr.bf16.mxu1 (!%p139_p2), %v570_v0  ;;  %v573_v3 = vld [vmem:[%s668_s1 + $0x18] sm:$0xff] (!%p139_p2)   ;;  %v574_v6 = vld [vmem:[%s668_s1 + $0x20] sm:$0xff] (!%p139_p2)   ;;  %v575_v7 = vld [vmem:[%s668_s1 + $0x28] sm:$0xff] (!%p139_p2)  }
   0x7   : > { %523 = vmatpush3.bf16.msra.mxu0 (!%p139_p2), %v570_v0  ;;  %554 = vmatpush3.bf16.msra.mxu1 (!%p139_p2), %v570_v0  ;;  %v576_v8 = vld [vmem:[%s668_s1 + $0x30] sm:$0xff] (!%p139_p2)   ;;  %v577_v9 = vld [vmem:[%s668_s1 + $0x38] sm:$0xff] (!%p139_p2)   ;;  %v456_v12 = vld [vmem:[%s669_s2] ss:$0 sm:$0xff] (!%p139_p2) }
   0x8   : > { %524 = vmatprep.subr.bf16.mxu0 (!%p139_p2), %v571_v1  ;;  %547 = vmatprep.subr.bf16.mxu1 (!%p139_p2), %v571_v1 }
   0xb   : > { %525 = vmatpush3.bf16.msra.mxu0 (!%p139_p2), %v571_v1  ;;  %555 = vmatpush3.bf16.msra.mxu1 (!%p139_p2), %v571_v1 }
   0xc   : > { %526 = vmatprep.subr.bf16.mxu0 (!%p139_p2), %v572_v2  ;;  %548 = vmatprep.subr.bf16.mxu1 (!%p139_p2), %v572_v2 }
   0xd   : > { %s672_s16 = smov (!%p163_p3, %s452_s16), 15 }
   0xe   : > { %s453_s21 = sshll.u32 %s672_s16, 2 }
   0xf   : > { %s635_s24 = scalar_lea.vmem %s667_s0, %s453_s21  ;;  %527 = vmatpush3.bf16.msra.mxu0 %v572_v2  ;;  %556 = vmatpush3.bf16.msra.mxu1 %v572_v2  ;;  %s172_s13 = scalar_lea.vmem %s670_s3, %s453_s21 }
  0x10   : > { %v578_v4 = vld [vmem:[%s635_s24] sm:$0xff]   ;;  %v579_v5 = vld [vmem:[%s635_s24 + $0x10] sm:$0xff]   ;;  %528 = vmatprep.subr.bf16.mxu0 %v573_v3  ;;  %549 = vmatprep.subr.bf16.mxu1 %v573_v3  ;;  %v580_v10 = vld [vmem:[%s635_s24 + $0x8] sm:$0xff]  }
  0x11   : > { %538 = vmatprep.mubr.bf16.mxu0 %v578_v4  ;;  %542 = vmatprep.mubr.bf16.mxu1 %v579_v5  ;;  %v581_v11 = vld [vmem:[%s635_s24 + $0x18] sm:$0xff]  }
  0x13   : > { %529 = vmatpush3.bf16.msra.mxu0 %v573_v3  ;;  %557 = vmatpush3.bf16.msra.mxu1 %v573_v3 }
  0x14   : > { %530 = vmatprep.subr.bf16.mxu0 %v574_v6  ;;  %550 = vmatprep.subr.bf16.mxu1 %v574_v6 }
  0x17   : > { %531 = vmatpush3.bf16.msra.mxu0 %v574_v6  ;;  %558 = vmatpush3.bf16.msra.mxu1 %v574_v6 }
  0x18   : > { %532 = vmatprep.subr.bf16.mxu0 %v575_v7  ;;  %551 = vmatprep.subr.bf16.mxu1 %v575_v7 }
  0x1b   : > { %533 = vmatpush3.bf16.msra.mxu0 %v575_v7  ;;  %559 = vmatpush3.bf16.msra.mxu1 %v575_v7 }
  0x1c   : > { %534 = vmatprep.subr.bf16.mxu0 %v576_v8  ;;  %552 = vmatprep.subr.bf16.mxu1 %v576_v8 }
  0x1f   : > { %535 = vmatpush3.bf16.msra.mxu0 %v576_v8  ;;  %560 = vmatpush3.bf16.msra.mxu1 %v576_v8 }
  0x20   : > { %536 = vmatprep.subr.bf16.mxu0 %v577_v9  ;;  %553 = vmatprep.subr.bf16.mxu1 %v577_v9 }
  0x23   : > { %537 = vmatpush3.bf16.msra.mxu0 %v577_v9  ;;  %561 = vmatpush3.bf16.msra.mxu1 %v577_v9 }
  0x26   : > { %539 = vmatmul.mubr.bf16.vlgmr.msra.gmra.mrb[0].mxu0 %v580_v10  ;;  %543 = vmatmul.mubr.bf16.vlgmr.msra.gmra.mrb[0].mxu1 %v581_v11 }
  0xf9   : > { %v540_v13 = vpop.f32.mrb[0].mxu0  ;;  %v544_v14 = vpop.f32.mrb[0].mxu1 }
  0xfa   : > { %v321_v15 = vadd.f32 %v540_v13, %v456_v12  ;;  %v337_v16 = vadd.f32 %v544_v14, %v456_v12  ;;  %v312_v17 = vpop.f32.mrb[1].mxu0  ;;  %v328_v18 = vpop.f32.mrb[1].mxu1 }
  0xfb   : > { %v313_v19 = vadd.f32 %v456_v12, %v312_v17  ;;  %v329_v20 = vadd.f32 %v456_v12, %v328_v18  ;;  %v541_v21 = vpop.f32.mrb[2].mxu0  ;;  %v545_v22 = vpop.f32.mrb[2].mxu1 }
  0xfc   : > { %v324_v23 = vadd.f32 %v541_v21, %v456_v12  ;;  %v340_v24 = vadd.f32 %v545_v22, %v456_v12  ;;  %v315_v25 = vpop.f32.mrb[3].mxu0  ;;  %v331_v26 = vpop.f32.mrb[3].mxu1  ;;  %v345_v29 = vmax.f32 %v321_v15, 0.0  ;;  %v349_v30 = vmax.f32 %v337_v16, 0.0 }
  0xfd   : > { %v316_v27 = vadd.f32 %v456_v12, %v315_v25  ;;  %v332_v28 = vadd.f32 %v456_v12, %v331_v26  ;;  %v343_v33 = vmax.f32 %v313_v19, 0.0  ;;  %v347_v34 = vmax.f32 %v329_v20, 0.0 }
  0xfe   : > { %v346_v31 = vmax.f32 %v324_v23, 0.0  ;;  %v350_v32 = vmax.f32 %v340_v24, 0.0 }
  0xff   : > { %v344_v35 = vmax.f32 %v316_v27, 0.0  ;;  %v348_v36 = vmax.f32 %v332_v28, 0.0 }
 0x100   : > { %v495_v37 = vpack.c.bf16 %v346_v31, %v345_v29  ;;  %v505_v38 = vpack.c.bf16 %v350_v32, %v349_v30 }
 0x101   : > { %v490_v39 = vpack.c.bf16 %v344_v35, %v343_v33  ;;  %v500_v40 = vpack.c.bf16 %v348_v36, %v347_v34 }
 0x102   : > { %507 = vst [vmem:[%s172_s13 + $0x8] sm:$0xff] %v495_v37   ;;  %509 = vst [vmem:[%s172_s13 + $0x18] sm:$0xff] %v505_v38  }
 0x103   : > { %491 = vst [vmem:[%s172_s13] sm:$0xff] %v490_v39   ;;  %508 = vst [vmem:[%s172_s13 + $0x10] sm:$0xff] %v500_v40  }
 0x104 PF: > { %s13_s12 = sadd.s32 1, %s588_s12  }
 0x105   : > { %p10_p4 = scmp.ge.s32.totalorder %s13_s12, 4  }
 0x107   :  { %12 = sbr.rel (!%p10_p4) target bundleno = 1 (0x1), region = 62 }

// kernel: discriminator_forward.9
= control target key start
LH: loop header
LB: loop body
LE: loop exit
PB: predicated region body
PF: predicated region fallthrough
CT: control target
= control target key end

     0   :  { %s1074_s21 = smov 0   ;;  %s1258_s0 = inlined_call_operand.vmem [shape: bf16[32,256], index: 0, kind: input, shape index: {}]   ;;  %s1259_s1 = inlined_call_operand.vmem [shape: bf16[256,128], index: 1, kind: input, shape index: {}]   ;;  %s1260_s2 = inlined_call_operand.vmem [shape: f32[1,128], index: 2, kind: input, shape index: {}]   ;;  %s1261_s3 = inlined_call_operand.vmem [shape: bf16[32,128], index: 3, kind: input, shape index: {}]   ;;  %s1262_s4 = inlined_call_operand.vmem [shape: bf16[128,512], index: 4, kind: input, shape index: {}]   ;;  %s1263_s5 = inlined_call_operand.vmem [shape: f32[1,128], index: 5, kind: input, shape index: {}]   ;;  %s1264_s6 = inlined_call_operand.vmem [shape: bf16[32,128], index: 6, kind: output, shape index: {}]  }
   0x1 LB: > { %s854_s22 = sadd.s32 4294967295, %s1036_s21   ;;  %p858_p0 = scmp.ge.s32.totalorder %s1036_s21, 1  ;;  %s1036_s21 = sphi %s1074_s21, %s16_s21  }
   0x2   : > { %p225_p1 = scmp.lt.s32.totalorder %s1036_s21, 3 }
   0x4   : > { %p226_p2 = pnand %p858_p0, %p225_p1 }
   0x5   : > { %v962_v0 = vld [vmem:[%s1259_s1 + $0x40] sm:$0xff] (!%p226_p2)   ;;  %s859_s27 = sshll.u32 (!%p226_p2), %s854_s22, 1  ;;  %v964_v2 = vld [vmem:[%s1259_s1 + $0x48] sm:$0xff] (!%p226_p2)   ;;  %v1038_v4 = vmov (!%p226_p2), 0   ;;  %v966_v5 = vld [vmem:[%s1259_s1 + $0x50] sm:$0xff] (!%p226_p2)  }
   0x6   : > { %229 = sbr.rel (%p226_p2) target bundleno = 295 (0x127), region = 44  ;;  %v963_v1 = vld [vmem:[%s1259_s1] sm:$0xff] (!%p226_p2)   ;;  %931 = vmatprep.subr.bf16.mxu0 (!%p226_p2), %v962_v0  ;;  %v965_v3 = vld [vmem:[%s1259_s1 + $0x8] sm:$0xff] (!%p226_p2)   ;;  %705 = vmatprep.mubr.bf16.mxu1 (!%p226_p2), %v1038_v4  ;;  %p262_p3 = scmp.lt.s32.totalorder (!%p226_p2), %s859_s27, 3  ;;  %v967_v6 = vld [vmem:[%s1259_s1 + $0x10] sm:$0xff] (!%p226_p2)  }
   0x7   : > { %932 = vmatpush3.bf16.msra.mxu0 (!%p226_p2), %v963_v1  ;;  %v968_v7 = vld [vmem:[%s1259_s1 + $0x58] sm:$0xff] (!%p226_p2)   ;;  %v970_v9 = vld [vmem:[%s1259_s1 + $0x60] sm:$0xff] (!%p226_p2)   ;;  %v972_v13 = vld [vmem:[%s1259_s1 + $0x68] sm:$0xff] (!%p226_p2)  }
   0x8   : > { %933 = vmatprep.subr.bf16.mxu0 (!%p226_p2), %v964_v2  ;;  %v969_v8 = vld [vmem:[%s1259_s1 + $0x18] sm:$0xff] (!%p226_p2)   ;;  %v971_v10 = vld [vmem:[%s1259_s1 + $0x20] sm:$0xff] (!%p226_p2)   ;;  %v973_v15 = vld [vmem:[%s1259_s1 + $0x28] sm:$0xff] (!%p226_p2)  }
   0x9   : > { %v976_v11 = vld [vmem:[%s1262_s4 + $0x4] ss:$16 sps:$4 sm:$0xff] (!%p226_p2)   ;;  %v978_v12 = vld [vmem:[%s1262_s4] ss:$16 sps:$4 sm:$0xff] (!%p226_p2)   ;;  %v979_v22 = vld [vmem:[%s1259_s1 + $0x78] sm:$0xff] (!%p226_p2)  }
   0xa   : > { %673 = vmatprep.subr.bf16.mxu1 (!%p226_p2), %v976_v11  ;;  %v981_v14 = vld [vmem:[%s1262_s4 + $0x24] ss:$16 sps:$4 sm:$0xff] (!%p226_p2)   ;;  %v986_v17 = vld [vmem:[%s1262_s4 + $0x20] ss:$16 sps:$4 sm:$0xff] (!%p226_p2)   ;;  %v980_v25 = vld [vmem:[%s1259_s1 + $0x38] sm:$0xff] (!%p226_p2)  }
   0xb   : > { %934 = vmatpush3.bf16.msra.mxu0 (!%p226_p2), %v965_v3  ;;  %674 = vmatpush1.bf16.msra.mxu1 (!%p226_p2), %v978_v12  ;;  %v974_v18 = vld [vmem:[%s1259_s1 + $0x70] sm:$0xff] (!%p226_p2)   ;;  %v989_v27 = vld [vmem:[%s1262_s4 + $0xc] ss:$16 sps:$4 sm:$0xff] (!%p226_p2)   ;;  %v987_v31 = vld [vmem:[%s1262_s4 + $0x8] ss:$16 sps:$4 sm:$0xff] (!%p226_p2)  }
   0xc   : > { %935 = vmatprep.subr.bf16.mxu0 (!%p226_p2), %v966_v5  ;;  %675 = vmatprep.subr.bf16.mxu1 (!%p226_p2), %v981_v14  ;;  %v990_v19 = vld [vmem:[%s1262_s4 + $0x44] ss:$16 sps:$4 sm:$0xff] (!%p226_p2)   ;;  %v992_v20 = vld [vmem:[%s1262_s4 + $0x40] ss:$16 sps:$4 sm:$0xff] (!%p226_p2)   ;;  %v995_v32 = vld [vmem:[%s1262_s4 + $0x2c] ss:$16 sps:$4 sm:$0xff] (!%p226_p2)  }
   0xd   : > { %s1266_s27 = smov (!%p262_p3, %s859_s27), 3  ;;  %v975_v21 = vld [vmem:[%s1259_s1 + $0x30] sm:$0xff]   ;;  %v993_v35 = vld [vmem:[%s1262_s4 + $0x28] ss:$16 sps:$4 sm:$0xff]   ;;  %v1001_v36 = vld [vmem:[%s1262_s4 + $0x4c] ss:$16 sps:$4 sm:$0xff]  }
   0xe   : > { %s923_s20 = sshll.u32 %s1266_s27, 3  ;;  %v996_v23 = vld [vmem:[%s1262_s4 + $0x64] ss:$16 sps:$4 sm:$0xff]   ;;  %v998_v24 = vld [vmem:[%s1262_s4 + $0x60] ss:$16 sps:$4 sm:$0xff]   ;;  %s863_s22 = sshll.u32 %s1266_s27, 2 }
   0xf   : > { %936 = vmatpush3.bf16.msra.mxu0 %v967_v6  ;;  %s1128_s7 = scalar_lea.vmem %s1258_s0, %s923_s20  ;;  %676 = vmatpush1.bf16.msra.mxu1 %v986_v17  ;;  %v1002_v26 = vld [vmem:[%s1262_s4 + $0x84] ss:$16 sps:$4 sm:$0xff]   ;;  %v1004_v28 = vld [vmem:[%s1262_s4 + $0x80] ss:$16 sps:$4 sm:$0xff]   ;;  %s272_s10 = scalar_lea.vmem %s1261_s3, %s863_s22  ;;  %v999_v39 = vld [vmem:[%s1262_s4 + $0x48] ss:$16 sps:$4 sm:$0xff]  }
  0x10   : > { %937 = vmatprep.subr.bf16.mxu0 %v968_v7  ;;  %v985_v16 = vld [vmem:[%s1128_s7 + $0x4] ss:$8 sps:$4 sm:$0xff]   ;;  %677 = vmatprep.subr.bf16.mxu1 %v990_v19  ;;  %v983_v29 = vld [vmem:[%s1128_s7] ss:$8 sps:$4 sm:$0xff]   ;;  %s278_s25 = scalar_lea.vmem %s1264_s6, %s863_s22 }
  0x11   : > { %460 = vmatprep.mubr.bf16.mxu0 %v985_v16  ;;  %v1008_v30 = vld [vmem:[%s1262_s4 + $0xa4] ss:$16 sps:$4 sm:$0xff]   ;;  %v1010_v33 = vld [vmem:[%s1262_s4 + $0xa0] ss:$16 sps:$4 sm:$0xff]   ;;  %v1007_v40 = vld [vmem:[%s1262_s4 + $0x6c] ss:$16 sps:$4 sm:$0xff]  }
  0x12   : > { %v1014_v34 = vld [vmem:[%s1262_s4 + $0xc4] ss:$16 sps:$4 sm:$0xff]   ;;  %v1016_v37 = vld [vmem:[%s1262_s4 + $0xc0] ss:$16 sps:$4 sm:$0xff]   ;;  %v1005_v42 = vld [vmem:[%s1262_s4 + $0x68] ss:$16 sps:$4 sm:$0xff]  }
  0x13   : > { %938 = vmatpush3.bf16.msra.mxu0 %v969_v8  ;;  %678 = vmatpush1.bf16.msra.mxu1 %v992_v20  ;;  %v1020_v38 = vld [vmem:[%s1262_s4 + $0xe4] ss:$16 sps:$4 sm:$0xff]   ;;  %v1022_v41 = vld [vmem:[%s1262_s4 + $0xe0] ss:$16 sps:$4 sm:$0xff]   ;;  %v1013_v43 = vld [vmem:[%s1262_s4 + $0x8c] ss:$16 sps:$4 sm:$0xff]  }
  0x14   : > { %939 = vmatprep.subr.bf16.mxu0 %v970_v9  ;;  %679 = vmatprep.subr.bf16.mxu1 %v996_v23  ;;  %v1026_v44 = vld [vmem:[%s272_s10] sm:$0xff]   ;;  %v1011_v45 = vld [vmem:[%s1262_s4 + $0x88] ss:$16 sps:$4 sm:$0xff]   ;;  %v1019_v46 = vld [vmem:[%s1262_s4 + $0xac] ss:$16 sps:$4 sm:$0xff]  }
  0x15   : > { %v1017_v47 = vld [vmem:[%s1262_s4 + $0xa8] ss:$16 sps:$4 sm:$0xff]   ;;  %v1025_v48 = vld [vmem:[%s1262_s4 + $0xcc] ss:$16 sps:$4 sm:$0xff]   ;;  %v866_v0 = vld [vmem:[%s1260_s2] ss:$0 sm:$0xff] }
  0x16   : > { %v1023_v49 = vld [vmem:[%s1262_s4 + $0xc8] ss:$16 sps:$4 sm:$0xff]   ;;  %v1029_v50 = vld [vmem:[%s1262_s4 + $0xec] ss:$16 sps:$4 sm:$0xff]   ;;  %v918_v16 = vld [vmem:[%s1263_s5] ss:$0 sm:$0xff] }
  0x17   : > { %940 = vmatpush3.bf16.msra.mxu0 %v971_v10  ;;  %680 = vmatpush1.bf16.msra.mxu1 %v998_v24  ;;  %v1027_v51 = vld [vmem:[%s1262_s4 + $0xe8] ss:$16 sps:$4 sm:$0xff]  }
  0x18   : > { %941 = vmatprep.subr.bf16.mxu0 %v972_v13  ;;  %681 = vmatprep.subr.bf16.mxu1 %v1002_v26 }
  0x1b   : > { %942 = vmatpush3.bf16.msra.mxu0 %v973_v15  ;;  %682 = vmatpush1.bf16.msra.mxu1 %v1004_v28 }
  0x1c   : > { %943 = vmatprep.subr.bf16.mxu0 %v974_v18  ;;  %683 = vmatprep.subr.bf16.mxu1 %v1008_v30 }
  0x1f   : > { %944 = vmatpush3.bf16.msra.mxu0 %v975_v21  ;;  %684 = vmatpush1.bf16.msra.mxu1 %v1010_v33 }
  0x20   : > { %945 = vmatprep.subr.bf16.mxu0 %v979_v22  ;;  %685 = vmatprep.subr.bf16.mxu1 %v1014_v34 }
  0x23   : > { %946 = vmatpush3.bf16.msra.mxu0 %v980_v25  ;;  %686 = vmatpush1.bf16.msra.mxu1 %v1016_v37 }
  0x24   : > { %716 = vmatprep.subr.bf16.mxu0 %v989_v27  ;;  %687 = vmatprep.subr.bf16.mxu1 %v1020_v38 }
  0x26   : > { %461 = vmatmul.mubr.bf16.vlgmr.msra.gmra.mrb[0].mxu0 %v983_v29 }
  0x27   : > { %717 = vmatpush1.bf16.msra.mxu0 %v987_v31  ;;  %748 = vmatprep.mubr.bf16.mxu0 %v1038_v4 }
  0x28   : > { %718 = vmatprep.subr.bf16.mxu0 %v995_v32  ;;  %688 = vmatpush1.bf16.msra.mxu1 %v1022_v41 }
  0x2b   : > { %719 = vmatpush1.bf16.msra.mxu0 %v993_v35  ;;  %706 = vmatmul.mubr.bf16.vlgmr.msra.gmra.mrb[0].mxu1 %v1026_v44 }
  0x2c   : > { %720 = vmatprep.subr.bf16.mxu0 %v1001_v36 }
  0x2f   : > { %721 = vmatpush1.bf16.msra.mxu0 %v999_v39 }
  0x30   : > { %722 = vmatprep.subr.bf16.mxu0 %v1007_v40 }
  0x33   : > { %723 = vmatpush1.bf16.msra.mxu0 %v1005_v42 }
  0x34   : > { %724 = vmatprep.subr.bf16.mxu0 %v1013_v43 }
  0x37   : > { %725 = vmatpush1.bf16.msra.mxu0 %v1011_v45 }
  0x38   : > { %726 = vmatprep.subr.bf16.mxu0 %v1019_v46 }
  0x3b   : > { %727 = vmatpush1.bf16.msra.mxu0 %v1017_v47 }
  0x3c   : > { %728 = vmatprep.subr.bf16.mxu0 %v1025_v48 }
  0x3f   : > { %729 = vmatpush1.bf16.msra.mxu0 %v1023_v49 }
  0x40   : > { %730 = vmatprep.subr.bf16.mxu0 %v1029_v50 }
  0x43   : > { %731 = vmatpush1.bf16.msra.mxu0 %v1027_v51 }
  0x46   : > { %749 = vmatmul.mubr.bf16.vlgmr.msra.gmra.mrb[4].mxu0 %v1026_v44 }
  0xf9   : > { %v947_v52 = vpop.f32.mrb[0].mxu0 }
  0xfa   : > { %v948_v53 = vpop.f32.mrb[1].mxu0 }
  0xfb   : > { %v949_v54 = vadd.f32 %v948_v53, %v947_v52  ;;  %v950_v55 = vpop.f32.mrb[2].mxu0 }
  0xfc   : > { %v951_v56 = vpop.f32.mrb[3].mxu0 }
  0xfd   : > { %v952_v57 = vadd.f32 %v951_v56, %v950_v55  ;;  %v463_v1 = vadd.f32 %v949_v54, %v866_v0 }
  0xfe   : > { %v707_v58 = vpop.f32.mrb[0].mxu1 }
  0xff   : > { %v709_v59 = vpop.f32.mrb[1].mxu1  ;;  %v466_v2 = vadd.f32 %v952_v57, %v866_v0  ;;  %v469_v3 = vmul.f32 0.2, %v463_v1 }
 0x100   : > { %v759_v60 = vmax.f32 %v707_v58, %v709_v59  ;;  %v711_v61 = vpop.f32.mrb[2].mxu1 }
 0x101   : > { %v713_v62 = vpop.f32.mrb[3].mxu1  ;;  %v470_v5 = vmul.f32 0.2, %v466_v2  ;;  %v471_v9 = vmax.f32 %v463_v1, %v469_v3 }
 0x102   : > { %v760_v63 = vmax.f32 %v711_v61, %v713_v62 }
 0x103   : > { %v472_v14 = vmax.f32 %v466_v2, %v470_v5 }
 0x119   : > { %v750_v4 = vpop.f32.mrb[4].mxu0 }
 0x11a   : > { %v761_v6 = vmax.f32 %v759_v60, %v750_v4  ;;  %v752_v7 = vpop.f32.mrb[5].mxu0 }
 0x11b   : > { %v754_v8 = vpop.f32.mrb[6].mxu0 }
 0x11c   : > { %v763_v10 = vmax.f32 %v761_v6, %v752_v7  ;;  %v762_v11 = vmax.f32 %v760_v63, %v754_v8  ;;  %v756_v12 = vpop.f32.mrb[7].mxu0 }
 0x11e   : > { %v765_v13 = vadd.f32 %v763_v10, %v471_v9  ;;  %v764_v15 = vmax.f32 %v762_v11, %v756_v12 }
 0x120   : > { %v766_v17 = vadd.f32 %v764_v15, %v472_v14  ;;  %v774_v18 = vadd.f32 %v918_v16, %v765_v13 }
 0x122   : > { %v775_v19 = vadd.f32 %v918_v16, %v766_v17 }
 0x124   : > { %v929_v20 = vpack.c.bf16 %v775_v19, %v774_v18 }
 0x126   : > { %930 = vst [vmem:[%s278_s25] sm:$0xff] %v929_v20  }
 0x127 PF: > { %s16_s21 = sadd.s32 1, %s1036_s21  }
 0x128   : > { %p13_p4 = scmp.ge.s32.totalorder %s16_s21, 4  }
 0x12a   :  { %15 = sbr.rel (!%p13_p4) target bundleno = 1 (0x1), region = 77 }

// kernel: discriminator_forward.10
= control target key start
LH: loop header
LB: loop body
LE: loop exit
PB: predicated region body
PF: predicated region fallthrough
CT: control target
= control target key end

     0   :  { %s446_s1 = inlined_call_operand.vmem [shape: bf16[256,128], index: 1, kind: input, shape index: {}]   ;;  %s447_s0 = inlined_call_operand.vmem [shape: bf16[32,256], index: 0, kind: input, shape index: {}]   ;;  %s448_s2 = inlined_call_operand.vmem [shape: f32[1,128], index: 2, kind: input, shape index: {}]   ;;  %s449_s3 = inlined_call_operand.vmem [shape: bf16[32,128], index: 3, kind: output, shape index: {}]  }
   0x1   :  { %v335_v0 = vld [vmem:[%s446_s1 + $0x40] sm:$0xff]   ;;  %v337_v2 = vld [vmem:[%s446_s1 + $0x48] sm:$0xff]   ;;  %v339_v4 = vld [vmem:[%s446_s1 + $0x50] sm:$0xff]  }
   0x2   :  { %v336_v1 = vld [vmem:[%s446_s1] sm:$0xff]   ;;  %291 = vmatprep.subr.bf16.mxu0 %v335_v0  ;;  %319 = vmatprep.subr.bf16.mxu1 %v335_v0  ;;  %v338_v3 = vld [vmem:[%s446_s1 + $0x8] sm:$0xff]   ;;  %v340_v5 = vld [vmem:[%s446_s1 + $0x10] sm:$0xff]  }
   0x3   :  { %292 = vmatpush3.bf16.msra.mxu0 %v336_v1  ;;  %327 = vmatpush3.bf16.msra.mxu1 %v336_v1  ;;  %v341_v6 = vld [vmem:[%s446_s1 + $0x58] sm:$0xff]   ;;  %v343_v8 = vld [vmem:[%s446_s1 + $0x60] sm:$0xff]   ;;  %v345_v10 = vld [vmem:[%s446_s1 + $0x68] sm:$0xff]  }
   0x4   :  { %293 = vmatprep.subr.bf16.mxu0 %v337_v2  ;;  %320 = vmatprep.subr.bf16.mxu1 %v337_v2  ;;  %v342_v7 = vld [vmem:[%s446_s1 + $0x18] sm:$0xff]   ;;  %v344_v9 = vld [vmem:[%s446_s1 + $0x20] sm:$0xff]   ;;  %v346_v13 = vld [vmem:[%s446_s1 + $0x28] sm:$0xff]  }
   0x5   :  { %v353_v11 = vld [vmem:[%s447_s0 + $0x4] ss:$8 sps:$4 sm:$0xff]   ;;  %v356_v12 = vld [vmem:[%s447_s0 + $0x14] ss:$8 sps:$4 sm:$0xff]   ;;  %v351_v18 = vld [vmem:[%s447_s0] ss:$8 sps:$4 sm:$0xff]  }
   0x6   :  { %v347_v14 = vld [vmem:[%s446_s1 + $0x70] sm:$0xff]   ;;  %206 = vmatprep.mubr.bf16.mxu0 %v353_v11  ;;  %214 = vmatprep.mubr.bf16.mxu1 %v356_v12  ;;  %v349_v16 = vld [vmem:[%s446_s1 + $0x78] sm:$0xff]   ;;  %v251_v22 = vld [vmem:[%s448_s2] ss:$0 sm:$0xff] }
   0x7   :  { %294 = vmatpush3.bf16.msra.mxu0 %v338_v3  ;;  %328 = vmatpush3.bf16.msra.mxu1 %v338_v3  ;;  %v348_v15 = vld [vmem:[%s446_s1 + $0x30] sm:$0xff]   ;;  %v350_v17 = vld [vmem:[%s446_s1 + $0x38] sm:$0xff]  }
   0x8   :  { %295 = vmatprep.subr.bf16.mxu0 %v339_v4  ;;  %321 = vmatprep.subr.bf16.mxu1 %v339_v4  ;;  %v354_v19 = vld [vmem:[%s447_s0 + $0x10] ss:$8 sps:$4 sm:$0xff]  }
   0xb   :  { %296 = vmatpush3.bf16.msra.mxu0 %v340_v5  ;;  %329 = vmatpush3.bf16.msra.mxu1 %v340_v5 }
   0xc   :  { %297 = vmatprep.subr.bf16.mxu0 %v341_v6  ;;  %322 = vmatprep.subr.bf16.mxu1 %v341_v6 }
   0xf   :  { %298 = vmatpush3.bf16.msra.mxu0 %v342_v7  ;;  %330 = vmatpush3.bf16.msra.mxu1 %v342_v7 }
  0x10   :  { %299 = vmatprep.subr.bf16.mxu0 %v343_v8  ;;  %323 = vmatprep.subr.bf16.mxu1 %v343_v8 }
  0x13   :  { %300 = vmatpush3.bf16.msra.mxu0 %v344_v9  ;;  %331 = vmatpush3.bf16.msra.mxu1 %v344_v9 }
  0x14   :  { %301 = vmatprep.subr.bf16.mxu0 %v345_v10  ;;  %324 = vmatprep.subr.bf16.mxu1 %v345_v10 }
  0x17   :  { %302 = vmatpush3.bf16.msra.mxu0 %v346_v13  ;;  %332 = vmatpush3.bf16.msra.mxu1 %v346_v13 }
  0x18   :  { %303 = vmatprep.subr.bf16.mxu0 %v347_v14  ;;  %325 = vmatprep.subr.bf16.mxu1 %v347_v14 }
  0x1b   :  { %304 = vmatpush3.bf16.msra.mxu0 %v348_v15  ;;  %333 = vmatpush3.bf16.msra.mxu1 %v348_v15 }
  0x1c   :  { %305 = vmatprep.subr.bf16.mxu0 %v349_v16  ;;  %326 = vmatprep.subr.bf16.mxu1 %v349_v16 }
  0x1f   :  { %306 = vmatpush3.bf16.msra.mxu0 %v350_v17  ;;  %334 = vmatpush3.bf16.msra.mxu1 %v350_v17 }
  0x22   :  { %207 = vmatmul.mubr.bf16.vlgmr.msra.gmra.mrb[0].mxu0 %v351_v18  ;;  %215 = vmatmul.mubr.bf16.vlgmr.msra.gmra.mrb[0].mxu1 %v354_v19 }
  0xf5   :  { %v307_v20 = vpop.f32.mrb[0].mxu0  ;;  %v313_v21 = vpop.f32.mrb[0].mxu1 }
  0xf6   :  { %v308_v23 = vpop.f32.mrb[1].mxu0  ;;  %v314_v24 = vpop.f32.mrb[1].mxu1 }
  0xf7   :  { %v309_v25 = vadd.f32 %v308_v23, %v307_v20  ;;  %v315_v26 = vadd.f32 %v314_v24, %v313_v21  ;;  %v310_v27 = vpop.f32.mrb[2].mxu0  ;;  %v316_v28 = vpop.f32.mrb[2].mxu1 }
  0xf8   :  { %v311_v29 = vpop.f32.mrb[3].mxu0  ;;  %v317_v30 = vpop.f32.mrb[3].mxu1 }
  0xf9   :  { %v209_v31 = vadd.f32 %v309_v25, %v251_v22  ;;  %v217_v32 = vadd.f32 %v315_v26, %v251_v22  ;;  %v312_v33 = vadd.f32 %v311_v29, %v310_v27  ;;  %v318_v34 = vadd.f32 %v317_v30, %v316_v28 }
  0xfb   :  { %v212_v35 = vadd.f32 %v312_v33, %v251_v22  ;;  %v220_v36 = vadd.f32 %v318_v34, %v251_v22  ;;  %v223_v37 = vmax.f32 %v209_v31, 0.0  ;;  %v225_v38 = vmax.f32 %v217_v32, 0.0 }
  0xfd   :  { %v224_v39 = vmax.f32 %v212_v35, 0.0  ;;  %v226_v40 = vmax.f32 %v220_v36, 0.0 }
  0xff   :  { %v283_v41 = vpack.c.bf16 %v224_v39, %v223_v37  ;;  %v288_v42 = vpack.c.bf16 %v226_v40, %v225_v38 }
 0x101   :  { %284 = vst [vmem:[%s449_s3] sm:$0xff] %v283_v41   ;;  %290 = vst [vmem:[%s449_s3 + $0x8] sm:$0xff] %v288_v42  }

// kernel: discriminator_forward.11
= control target key start
LH: loop header
LB: loop body
LE: loop exit
PB: predicated region body
PF: predicated region fallthrough
CT: control target
= control target key end

     0   :  { %v668_v35 = vmov 0.0   ;;  %vm669_vm0 = vmmov 0   ;;  %s843_s1 = inlined_call_operand.vmem [shape: bf16[512,128], index: 1, kind: input, shape index: {}]   ;;  %s844_s0 = inlined_call_operand.vmem [shape: bf16[8,512], index: 0, kind: input, shape index: {}]   ;;  %s845_s4 = inlined_call_operand.vmem [shape: bf16[128,128], index: 4, kind: input, shape index: {}]   ;;  %s846_s3 = inlined_call_operand.vmem [shape: bf16[8,128], index: 3, kind: input, shape index: {}]   ;;  %s847_s2 = inlined_call_operand.vmem [shape: f32[1,128], index: 2, kind: input, shape index: {}]   ;;  %s848_s5 = inlined_call_operand.vmem [shape: f32[1,128], index: 5, kind: input, shape index: {}]   ;;  %s849_s6 = inlined_call_operand.vmem [shape: f32[8,128], index: 6, kind: output, shape index: {}]  }
   0x1   :  { %v624_v0 = vld [vmem:[%s843_s1 + $0x40] sm:$0xff]   ;;  %v628_v4 = vld [vmem:[%s843_s1 + $0x48] sm:$0xff]   ;;  %v632_v8 = vld [vmem:[%s843_s1 + $0x50] sm:$0xff]  }
   0x2   :  { %v625_v1 = vld [vmem:[%s843_s1] sm:$0xff]   ;;  %549 = vmatprep.subr.bf16.mxu0 %v624_v0  ;;  %v629_v5 = vld [vmem:[%s843_s1 + $0x8] sm:$0xff]   ;;  %v633_v9 = vld [vmem:[%s843_s1 + $0x10] sm:$0xff]  }
   0x3   :  { %v626_v2 = vld [vmem:[%s843_s1 + $0xc0] sm:$0xff]   ;;  %550 = vmatpush3.bf16.msra.mxu0 %v625_v1  ;;  %v630_v6 = vld [vmem:[%s843_s1 + $0xc8] sm:$0xff]   ;;  %v634_v10 = vld [vmem:[%s843_s1 + $0xd0] sm:$0xff]  }
   0x4   :  { %v627_v3 = vld [vmem:[%s843_s1 + $0x80] sm:$0xff]   ;;  %571 = vmatprep.subr.bf16.mxu1 %v626_v2  ;;  %551 = vmatprep.subr.bf16.mxu0 %v628_v4  ;;  %v631_v7 = vld [vmem:[%s843_s1 + $0x88] sm:$0xff]   ;;  %v635_v11 = vld [vmem:[%s843_s1 + $0x90] sm:$0xff]  }
   0x5   :  { %572 = vmatpush3.bf16.msra.mxu1 %v627_v3  ;;  %v636_v12 = vld [vmem:[%s843_s1 + $0x58] sm:$0xff]   ;;  %v640_v16 = vld [vmem:[%s843_s1 + $0x60] sm:$0xff]   ;;  %v644_v20 = vld [vmem:[%s843_s1 + $0x68] sm:$0xff]  }
   0x6   :  { %573 = vmatprep.subr.bf16.mxu1 %v630_v6  ;;  %v637_v13 = vld [vmem:[%s843_s1 + $0x18] sm:$0xff]   ;;  %v641_v17 = vld [vmem:[%s843_s1 + $0x20] sm:$0xff]   ;;  %v645_v21 = vld [vmem:[%s843_s1 + $0x28] sm:$0xff]  }
   0x7   :  { %552 = vmatpush3.bf16.msra.mxu0 %v629_v5  ;;  %v638_v14 = vld [vmem:[%s843_s1 + $0xd8] sm:$0xff]   ;;  %v642_v18 = vld [vmem:[%s843_s1 + $0xe0] sm:$0xff]   ;;  %v646_v22 = vld [vmem:[%s843_s1 + $0xe8] sm:$0xff]  }
   0x8   :  { %553 = vmatprep.subr.bf16.mxu0 %v632_v8  ;;  %v639_v15 = vld [vmem:[%s843_s1 + $0x98] sm:$0xff]   ;;  %v643_v19 = vld [vmem:[%s843_s1 + $0xa0] sm:$0xff]   ;;  %v647_v23 = vld [vmem:[%s843_s1 + $0xa8] sm:$0xff]  }
   0x9   :  { %574 = vmatpush3.bf16.msra.mxu1 %v631_v7  ;;  %v648_v24 = vld [vmem:[%s843_s1 + $0x70] sm:$0xff]   ;;  %v652_v28 = vld [vmem:[%s843_s1 + $0x78] sm:$0xff]   ;;  %v24_v31 = vld [vmem:[%s844_s0] sm:$0xff] }
   0xa   :  { %575 = vmatprep.subr.bf16.mxu1 %v634_v10  ;;  %v649_v25 = vld [vmem:[%s843_s1 + $0x30] sm:$0xff]   ;;  %v653_v29 = vld [vmem:[%s843_s1 + $0x38] sm:$0xff]   ;;  %v504_v32 = vcombine.low %v24_v31, %v24_v31  ;;  %v505_v33 = vcombine.high %v24_v31, %v24_v31  ;;  %v25_v36 = vld [vmem:[%s844_s0 + $0x8] sm:$0xff] }
   0xb   :  { %554 = vmatpush3.bf16.msra.mxu0 %v633_v9  ;;  %v650_v26 = vld [vmem:[%s843_s1 + $0xf0] sm:$0xff]   ;;  %v654_v30 = vld [vmem:[%s843_s1 + $0xf8] sm:$0xff]   ;;  %v506_v37 = vcombine.low %v25_v36, %v25_v36  ;;  %v507_v38 = vcombine.high %v25_v36, %v25_v36  ;;  %v660_v39 = vld [vmem:[%s845_s4] sm:$0xff]  }
   0xc   :  { %555 = vmatprep.subr.bf16.mxu0 %v636_v12  ;;  %v651_v27 = vld [vmem:[%s843_s1 + $0xb0] sm:$0xff]   ;;  %v657_v34 = vld [vmem:[%s843_s1 + $0xb8] sm:$0xff]   ;;  %335 = vmatprep.mubr.bf16.mxu0 %v505_v33  ;;  %v661_v40 = vld [vmem:[%s845_s4 + $0x8] sm:$0xff]  }
   0xd   :  { %576 = vmatpush3.bf16.msra.mxu1 %v635_v11  ;;  %375 = vmatprep.mubr.bf16.mxu1 %v507_v38  ;;  %v662_v41 = vld [vmem:[%s845_s4 + $0x10] sm:$0xff]   ;;  %v663_v42 = vld [vmem:[%s845_s4 + $0x18] sm:$0xff]   ;;  %v664_v43 = vld [vmem:[%s845_s4 + $0x20] sm:$0xff]  }
   0xe   :  { %577 = vmatprep.subr.bf16.mxu1 %v638_v14  ;;  %v665_v44 = vld [vmem:[%s845_s4 + $0x28] sm:$0xff]   ;;  %v666_v45 = vld [vmem:[%s845_s4 + $0x30] sm:$0xff]   ;;  %v667_v46 = vld [vmem:[%s845_s4 + $0x38] sm:$0xff]  }
   0xf   :  { %556 = vmatpush3.bf16.msra.mxu0 %v637_v13  ;;  %v384_v47 = vld [vmem:[%s846_s3] sm:$0xf] }
  0x10   :  { %557 = vmatprep.subr.bf16.mxu0 %v640_v16  ;;  %v503_v49 = vld [vmem:[%s847_s2] ss:$0 sm:$0xff] }
  0x11   :  { %578 = vmatpush3.bf16.msra.mxu1 %v639_v15  ;;  %v548_v63 = vld [vmem:[%s848_s5] ss:$0 sm:$0xff] }
  0x12   :  { %579 = vmatprep.subr.bf16.mxu1 %v642_v18 }
  0x13   :  { %558 = vmatpush3.bf16.msra.mxu0 %v641_v17 }
  0x14   :  { %559 = vmatprep.subr.bf16.mxu0 %v644_v20 }
  0x15   :  { %580 = vmatpush3.bf16.msra.mxu1 %v643_v19 }
  0x16   :  { %581 = vmatprep.subr.bf16.mxu1 %v646_v22 }
  0x17   :  { %560 = vmatpush3.bf16.msra.mxu0 %v645_v21 }
  0x18   :  { %561 = vmatprep.subr.bf16.mxu0 %v648_v24 }
  0x19   :  { %582 = vmatpush3.bf16.msra.mxu1 %v647_v23 }
  0x1a   :  { %583 = vmatprep.subr.bf16.mxu1 %v650_v26 }
  0x1b   :  { %562 = vmatpush3.bf16.msra.mxu0 %v649_v25 }
  0x1c   :  { %563 = vmatprep.subr.bf16.mxu0 %v652_v28 }
  0x1d   :  { %584 = vmatpush3.bf16.msra.mxu1 %v651_v27 }
  0x1e   :  { %585 = vmatprep.subr.bf16.mxu1 %v654_v30 }
  0x1f   :  { %564 = vmatpush3.bf16.msra.mxu0 %v653_v29 }
  0x20   :  { %602 = vmatprep.subr.bf16.mxu0 %v668_v35 }
  0x21   :  { %586 = vmatpush3.bf16.msra.mxu1 %v657_v34 }
  0x22   :  { %336 = vmatmul.mubr.bf16.vlgmr.msra.gmra.mrb[0].mxu0 %v504_v32 }
  0x23   :  { %603 = vmatpush3.bf16.msra.mxu0 %v660_v39  ;;  %618 = vmatprep.mubr.msk.bf16.mxu0 %vm669_vm0, %v668_v35 }
  0x24   :  { %376 = vmatmul.mubr.bf16.vlgmr.msra.gmra.mrb[0].mxu1 %v506_v37  ;;  %604 = vmatprep.subr.bf16.mxu0 %v668_v35 }
  0x27   :  { %605 = vmatpush3.bf16.msra.mxu0 %v661_v40 }
  0x28   :  { %606 = vmatprep.subr.bf16.mxu0 %v668_v35 }
  0x2b   :  { %607 = vmatpush3.bf16.msra.mxu0 %v662_v41 }
  0x2c   :  { %608 = vmatprep.subr.bf16.mxu0 %v668_v35 }
  0x2f   :  { %609 = vmatpush3.bf16.msra.mxu0 %v663_v42 }
  0x30   :  { %610 = vmatprep.subr.bf16.mxu0 %v668_v35 }
  0x33   :  { %611 = vmatpush3.bf16.msra.mxu0 %v664_v43 }
  0x34   :  { %612 = vmatprep.subr.bf16.mxu0 %v668_v35 }
  0x37   :  { %613 = vmatpush3.bf16.msra.mxu0 %v665_v44 }
  0x38   :  { %614 = vmatprep.subr.bf16.mxu0 %v668_v35 }
  0x3b   :  { %615 = vmatpush3.bf16.msra.mxu0 %v666_v45 }
  0x3c   :  { %616 = vmatprep.subr.bf16.mxu0 %v668_v35 }
  0x3f   :  { %617 = vmatpush3.bf16.msra.mxu0 %v667_v46 }
  0x42   :  { %619 = vmatmul.mubr.bf16.vlgmr.msra.gmra.mrb[4].mxu0 %v384_v47 }
  0xf5   :  { %v565_v48 = vpop.f32.mrb[0].mxu0 }
  0xf6   :  { %v566_v50 = vpop.f32.mrb[1].mxu0 }
  0xf7   :  { %v567_v51 = vadd.f32 %v566_v50, %v565_v48  ;;  %v568_v52 = vpop.f32.mrb[2].mxu0  ;;  %v587_v53 = vpop.f32.mrb[0].mxu1 }
  0xf8   :  { %v569_v54 = vpop.f32.mrb[3].mxu0  ;;  %v588_v55 = vpop.f32.mrb[1].mxu1 }
  0xf9   :  { %v338_v56 = vadd.f32 %v567_v51, %v503_v49  ;;  %v589_v57 = vadd.f32 %v588_v55, %v587_v53  ;;  %v590_v58 = vpop.f32.mrb[2].mxu1 }
  0xfa   :  { %v591_v59 = vpop.f32.mrb[3].mxu1 }
  0xfb   :  { %v378_v60 = vadd.f32 %v589_v57, %v338_v56 }
  0xfd   :  { %v383_v61 = vmax.f32 %v378_v60, 0.0 }
 0x115   :  { %v483_v62 = vpop.f32.mrb[4].mxu0 }
 0x116   :  { %v489_v0 = vadd.f32 %v483_v62, %v383_v61  ;;  %v620_v1 = vpop.f32.mrb[5].mxu0 }
 0x117   :  { %v486_v2 = vpop.f32.mrb[6].mxu0 }
 0x118   :  { %v497_v3 = vadd.f32 %v548_v63, %v489_v0  ;;  %v621_v4 = vpop.f32.mrb[7].mxu0 }
 0x11a   :  { %498 = vst [vmem:[%s849_s6] sm:$0xff] %v497_v3 }

</bundles_post_ra>
